<compile_context>
chip_gen: v7x
topology: tpu7x:2x2x1
jax: 0.10.0
libtpu: 0.0.40
codegen_flags: <defaults>
</compile_context>

<pallas_src>
import functools

import jax
import jax.numpy as jnp
from jax.experimental import pallas as pl
from jax.experimental.pallas import tpu as pltpu

H_DIM = 500


def _round_up(x, m):
    return (x + m - 1) // m * m


def mlp_kernel(y_ref, w1_ref, b1_ref, w2_ref, b2_ref, o_ref):
    # Layer 1: cast the streamed input tile to the weight dtype (bf16) on the
    # fly; short-K matmul on the MXU with f32 accumulation; bias + ReLU in f32.
    y = y_ref[...].astype(w1_ref.dtype)
    h = jnp.dot(y, w1_ref[...], preferred_element_type=jnp.float32)
    h = jnp.maximum(h + b1_ref[...], 0.0)
    # Layer 2: cast the f32 activation back to the weight dtype for the MXU.
    o = jnp.dot(h.astype(w2_ref.dtype), w2_ref[...],
                preferred_element_type=jnp.float32)
    o = jnp.maximum(o + b2_ref[...], 0.0)
    o_ref[...] = o.astype(o_ref.dtype)


def prepare_params(w1, b1, w2, b2, compute_dtype=jnp.bfloat16):
    """One-time padding + cast of the parameters (hoisted out of the forward).

    w1: (dim_y, H); b1: (1, H); w2: (H, H); b2: (1, H) with H = 500.
    Hidden dim is zero-padded to 512 (lane-dense, MXU-aligned); weights are
    cast to `compute_dtype`, biases stay f32. Zero padding is inert through
    both matmuls and the ReLUs.
    """
    dim_y, h_dim = w1.shape
    h_pad = _round_up(h_dim, 128)          # 500 -> 512
    cdt = compute_dtype
    w1p = jnp.zeros((dim_y, h_pad), cdt).at[:, :h_dim].set(w1.astype(cdt))
    w2p = jnp.zeros((h_pad, h_pad), cdt).at[:h_dim, :h_dim].set(w2.astype(cdt))
    b1p = jnp.zeros((1, h_pad), jnp.float32).at[:, :h_dim].set(b1.astype(jnp.float32))
    b2p = jnp.zeros((1, h_pad), jnp.float32).at[:, :h_dim].set(b2.astype(jnp.float32))
    return (w1p, b1p, w2p, b2p)


def py_mnist_forward(y, padded_params, h_dim=H_DIM, *,
                     num_batch_tiles=None,
                     out_dtype=jnp.bfloat16,
                     strip_padding=True):
    """Fused two-layer MLP forward.

    y: (B, dim_y) f32 (streamed unpadded; cast to bf16 inside the kernel).
    padded_params: output of prepare_params().
    num_batch_tiles: grid size over the batch. Default: 2 when B >= 256
      (one tile per v7x TensorCore), else 1 (single step on v5e/v6e). Pass 1
      explicitly on single-TC chips for a 256-tall MXU tile at B=256.
    Returns (B, h_dim) in `out_dtype` (or the padded (b_pad, 512) slab when
    strip_padding=False, useful when the consumer is fused and tolerates the
    inert zero columns).
    """
    w1p, b1p, w2p, b2p = padded_params
    B, dim_y = y.shape
    h_pad = w1p.shape[1]

    if num_batch_tiles is None:
        num_batch_tiles = 2 if B >= 256 else 1
    # 16-row floor per tile (bf16 packs 16 rows per vreg sublane group).
    b_pad = _round_up(B, 16 * num_batch_tiles)
    tm = b_pad // num_batch_tiles

    # Only materialize a padded batch if actually needed (no-op at B % tiling == 0).
    yp = y if b_pad == B else jnp.zeros((b_pad, dim_y), y.dtype).at[:B].set(y)

    flops = 2 * b_pad * (dim_y * h_pad + h_pad * h_pad)
    bytes_accessed = (
        yp.size * yp.dtype.itemsize
        + w1p.size * w1p.dtype.itemsize + w2p.size * w2p.dtype.itemsize
        + (b1p.size + b2p.size) * 4
        + b_pad * h_pad * jnp.dtype(out_dtype).itemsize
    )

    out = pl.pallas_call(
        mlp_kernel,
        out_shape=jax.ShapeDtypeStruct((b_pad, h_pad), out_dtype),
        grid_spec=pltpu.PrefetchScalarGridSpec(
            num_scalar_prefetch=0,
            grid=(num_batch_tiles,),
            in_specs=[
                pl.BlockSpec((tm, dim_y), lambda i: (i, 0)),      # y tile (full K)
                pl.BlockSpec((dim_y, h_pad), lambda i: (0, 0)),   # W1 (resident)
                pl.BlockSpec((1, h_pad), lambda i: (0, 0)),       # b1
                pl.BlockSpec((h_pad, h_pad), lambda i: (0, 0)),   # W2 (resident)
                pl.BlockSpec((1, h_pad), lambda i: (0, 0)),       # b2
            ],
            out_specs=pl.BlockSpec((tm, h_pad), lambda i: (i, 0)),
        ),
        compiler_params=pltpu.CompilerParams(
            dimension_semantics=("parallel",),
        ),
        cost_estimate=pl.CostEstimate(
            flops=int(flops), transcendentals=0,
            bytes_accessed=int(bytes_accessed)),
    )(yp, w1p, b1p, w2p, b2p)

    if strip_padding:
        out = out[:B, :h_dim]
    return out


def init_params(key, dim_y, h_dim=H_DIM, dtype=jnp.float32):
    """Deterministic init mimicking nn.Linear's U(-1/sqrt(fan_in), +1/sqrt(fan_in))."""
    k1, k2, k3, k4 = jax.random.split(key, 4)
    s1 = 1.0 / jnp.sqrt(dim_y)
    s2 = 1.0 / jnp.sqrt(h_dim)
    # Stored as (in_features, out_features) == PyTorch weight transposed.
    w1 = jax.random.uniform(k1, (dim_y, h_dim), dtype, minval=-s1, maxval=s1)
    b1 = jax.random.uniform(k2, (1, h_dim), dtype, minval=-s1, maxval=s1)
    w2 = jax.random.uniform(k3, (h_dim, h_dim), dtype, minval=-s2, maxval=s2)
    b2 = jax.random.uniform(k4, (1, h_dim), dtype, minval=-s2, maxval=s2)
    return w1, b1, w2, b2


if __name__ == "__main__":
    key = jax.random.PRNGKey(0)
    k_in, k_par = jax.random.split(key)

    # B=256 -> 2 "parallel" tiles of 128 rows (one per v7x TensorCore);
    # single-TC chips can pass num_batch_tiles=1 for one 256-tall tile.
    B, dim_y, h_dim = 256, 32, 500
    y = jax.random.normal(k_in, (B, dim_y), dtype=jnp.float32)
    w1, b1, w2, b2 = init_params(k_par, dim_y, h_dim)

    # Pad/cast the parameters ONCE (amortized out of the forward path).
    padded_params = prepare_params(w1, b1, w2, b2)

    # jit the whole forward so the (row/col) un-padding slice stays fused with
    # the pallas_call in one XLA program.
    fwd = jax.jit(lambda yy, pp: py_mnist_forward(yy, pp, h_dim=h_dim))
    out = jax.block_until_ready(fwd(y, padded_params))
    assert out.shape == (B, h_dim), out.shape
    out_f32 = out.astype(jnp.float32)

    # Reference 1: same bf16-operand / f32-accumulate arithmetic as the kernel
    # (tolerance also covers the bf16 output rounding).
    bf = jnp.bfloat16
    ref_h = jnp.maximum(
        jnp.dot(y.astype(bf), w1.astype(bf), preferred_element_type=jnp.float32) + b1, 0.0)
    ref_bf16 = jnp.maximum(
        jnp.dot(ref_h.astype(bf), w2.astype(bf), preferred_element_type=jnp.float32) + b2, 0.0)
    assert jnp.allclose(out_f32, ref_bf16, atol=3e-2, rtol=2e-2), "mismatch vs bf16 reference"

    # Reference 2: full-precision PyTorch-equivalent forward (loose tolerance
    # covers the bf16 operand/output rounding).
    ref_f32 = jnp.maximum(y @ w1 + b1, 0.0)
    ref_f32 = jnp.maximum(ref_f32 @ w2 + b2, 0.0)
    assert jnp.allclose(out_f32, ref_f32, atol=1e-1, rtol=1e-1), "mismatch vs f32 reference"

    print("KERNEL_OK")
</pallas_src>

<mosaic_0001>
module attributes {stable_mosaic.version = 11 : i64} {
  func.func @mlp_kernel(%arg0: i32, %arg1: memref<128x32xf32, #tpu.memory_space<vmem>>, %arg2: memref<32x512xbf16, #tpu.memory_space<vmem>>, %arg3: memref<1x512xf32, #tpu.memory_space<vmem>>, %arg4: memref<512x512xbf16, #tpu.memory_space<vmem>>, %arg5: memref<1x512xf32, #tpu.memory_space<vmem>>, %arg6: memref<128x512xbf16, #tpu.memory_space<vmem>>) attributes {dimension_semantics = [#tpu.dimension_semantics<parallel>], iteration_bounds = array<i64: 2>, scalar_prefetch = 0 : i64, scratch_operands = 0 : i64, tpu.core_type = #tpu.core_type<tc>, window_params = [{transform_indices = @transform_0, window_bounds = array<i64: 128, 32>}, {pipeline_mode = #tpu.pipeline_mode<synchronous>, transform_indices = @transform_1, window_bounds = array<i64: 32, 512>}, {pipeline_mode = #tpu.pipeline_mode<synchronous>, transform_indices = @transform_2, window_bounds = array<i64: 1, 512>}, {pipeline_mode = #tpu.pipeline_mode<synchronous>, transform_indices = @transform_3, window_bounds = array<i64: 512, 512>}, {pipeline_mode = #tpu.pipeline_mode<synchronous>, transform_indices = @transform_4, window_bounds = array<i64: 1, 512>}, {transform_indices = @transform_5, window_bounds = array<i64: 128, 512>}]} {
    %c0 = arith.constant 0 : index
    %c0_0 = arith.constant 0 : index
    %0 = vector.load %arg1[%c0, %c0_0] : memref<128x32xf32, #tpu.memory_space<vmem>>, vector<128x32xf32>
    %1 = arith.truncf %0 : vector<128x32xf32> to vector<128x32xbf16>
    %c0_1 = arith.constant 0 : index
    %c0_2 = arith.constant 0 : index
    %2 = vector.load %arg2[%c0_1, %c0_2] : memref<32x512xbf16, #tpu.memory_space<vmem>>, vector<32x512xbf16>
    %cst = arith.constant dense<0.000000e+00> : vector<128x512xf32>
    %3 = tpu.matmul %1, %2, %cst {dimension_numbers = #tpu.dot_dimension_numbers<[1], [0], [0], [1], [0, 0, 1, 1], [], []>} : vector<128x32xbf16>, vector<32x512xbf16>, vector<128x512xf32> -> vector<128x512xf32>
    %c0_3 = arith.constant 0 : index
    %c0_4 = arith.constant 0 : index
    %4 = vector.load %arg3[%c0_3, %c0_4] : memref<1x512xf32, #tpu.memory_space<vmem>>, vector<1x512xf32>
    %5 = vector.broadcast %4 : vector<1x512xf32> to vector<128x512xf32>
    %6 = arith.addf %3, %5 : vector<128x512xf32>
    %cst_5 = arith.constant 0.000000e+00 : f32
    %7 = vector.broadcast %cst_5 : f32 to vector<128x512xf32>
    %8 = arith.maximumf %6, %7 : vector<128x512xf32>
    %9 = arith.truncf %8 : vector<128x512xf32> to vector<128x512xbf16>
    %c0_6 = arith.constant 0 : index
    %c0_7 = arith.constant 0 : index
    %10 = vector.load %arg4[%c0_6, %c0_7] : memref<512x512xbf16, #tpu.memory_space<vmem>>, vector<512x512xbf16>
    %cst_8 = arith.constant dense<0.000000e+00> : vector<128x512xf32>
    %11 = tpu.matmul %9, %10, %cst_8 {dimension_numbers = #tpu.dot_dimension_numbers<[1], [0], [0], [1], [0, 0, 1, 1], [], []>} : vector<128x512xbf16>, vector<512x512xbf16>, vector<128x512xf32> -> vector<128x512xf32>
    %c0_9 = arith.constant 0 : index
    %c0_10 = arith.constant 0 : index
    %12 = vector.load %arg5[%c0_9, %c0_10] : memref<1x512xf32, #tpu.memory_space<vmem>>, vector<1x512xf32>
    %13 = vector.broadcast %12 : vector<1x512xf32> to vector<128x512xf32>
    %14 = arith.addf %11, %13 : vector<128x512xf32>
    %cst_11 = arith.constant 0.000000e+00 : f32
    %15 = vector.broadcast %cst_11 : f32 to vector<128x512xf32>
    %16 = arith.maximumf %14, %15 : vector<128x512xf32>
    %17 = arith.truncf %16 : vector<128x512xf32> to vector<128x512xbf16>
    %c0_12 = arith.constant 0 : index
    %c0_13 = arith.constant 0 : index
    %18 = vector.load %arg6[%c0_12, %c0_13] : memref<128x512xbf16, #tpu.memory_space<vmem>>, vector<128x512xbf16>
    tpu.vector_store %arg6[%c0_12, %c0_13], %17 {strides = array<i32>} : memref<128x512xbf16, #tpu.memory_space<vmem>>, vector<128x512xbf16>,
    return
  }
  func.func @transform_0(%arg0: i32) -> (i32, i32) {
    %c0_i32 = arith.constant 0 : i32
    %c0_i32_0 = arith.constant 0 : i32
    return %arg0, %c0_i32 : i32, i32
  }
  func.func @transform_1(%arg0: i32) -> (i32, i32) {
    %c0_i32 = arith.constant 0 : i32
    %c0_i32_0 = arith.constant 0 : i32
    %c0_i32_1 = arith.constant 0 : i32
    return %c0_i32, %c0_i32_0 : i32, i32
  }
  func.func @transform_2(%arg0: i32) -> (i32, i32) {
    %c0_i32 = arith.constant 0 : i32
    %c0_i32_0 = arith.constant 0 : i32
    %c0_i32_1 = arith.constant 0 : i32
    return %c0_i32, %c0_i32_0 : i32, i32
  }
  func.func @transform_3(%arg0: i32) -> (i32, i32) {
    %c0_i32 = arith.constant 0 : i32
    %c0_i32_0 = arith.constant 0 : i32
    %c0_i32_1 = arith.constant 0 : i32
    return %c0_i32, %c0_i32_0 : i32, i32
  }
  func.func @transform_4(%arg0: i32) -> (i32, i32) {
    %c0_i32 = arith.constant 0 : i32
    %c0_i32_0 = arith.constant 0 : i32
    %c0_i32_1 = arith.constant 0 : i32
    return %c0_i32, %c0_i32_0 : i32, i32
  }
  func.func @transform_5(%arg0: i32) -> (i32, i32) {
    %c0_i32 = arith.constant 0 : i32
    %c0_i32_0 = arith.constant 0 : i32
    return %arg0, %c0_i32 : i32, i32
  }
}

</mosaic_0001>

<bundles_post_ra>
// kernel: _lambda_.1
= control target key start
LH: loop header
LB: loop body
LE: loop exit
PB: predicated region body
PF: predicated region fallthrough
CT: control target
= control target key end

     0   :  { %10 = vsyncpa [#allocation3], 0  ;;  %s2946_s18 = smov 0   ;;  %s3341_s0 = inlined_call_operand.vmem [shape: f32[256,32], index: 0, kind: input, shape index: {}]   ;;  %s3342_s1 = inlined_call_operand.vmem [shape: bf16[32,512], index: 1, kind: input, shape index: {}]   ;;  %s3343_s2 = inlined_call_operand.vmem [shape: f32[1,512], index: 2, kind: input, shape index: {}]   ;;  %s3344_s3 = inlined_call_operand.hbm [shape: bf16[512,512], index: 3, kind: input, shape index: {}]   ;;  %s3345_s4 = inlined_call_operand.vmem [shape: f32[1,512], index: 4, kind: input, shape index: {}]   ;;  %s3346_s5 = inlined_call_operand.vmem [shape: bf16[256,512], index: 5, kind: output, shape index: {}]  }
   0x1 LB: > { %s2287_s19 = sadd.s32 4294967295, %s2910_s18   ;;  %p2289_p0 = scmp.ge.s32.totalorder %s2910_s18, 1  ;;  %s2910_s18 = sphi %s2946_s18, %s16_s18  }
   0x2   : > { %p157_p1 = scmp.lt.s32.totalorder %s2910_s18, 3  ;;  %s2912_s20 = smov [#allocation2]  }
   0x3   : > { %s175_s21 = sshll.u32 %s2912_s20, 4  ;;  %p2960_p3 = scmp.eq.s32.totalorder %s2287_s19, 0  ;;  %s176_s21 = int_to_ptr.vmem [resolvable:$true] %s175_s21 }
   0x4   : > { %p2954_p2 = pnand %p2289_p0, %p157_p1  ;;  %s2872_s27 = scalar_lea.hbm %s3344_s3, 16384 }
   0x5   : > { %s3351_s23 = scalar_select %p2960_p3, 1, 0 }
   0x6   : > { %s3350_s22 = scalar_select %p2954_p2, 1, 0 }
   0x7   : > { %p2650_p4 = pneg %p2954_p2  ;;  %p2873_p6 = scmp.ne.s32.totalorder %s3344_s3, %s2872_s27 }
   0x8   : > { %p2879_p10 = scmp.lt.u32.totalorder %s2872_s27, %s3344_s3 }
   0x9   : > { %p2968_p5 = pnand %p2960_p3, %p2650_p4 }
   0xb   : > { %p2874_p7 = pneg %p2968_p5 }
   0xd   : > { %p2875_p8 = pnand %p2874_p7, %p2873_p6 }
   0xf   : > { %p2876_p9 = pneg %p2875_p8 }
  0x11   : > { %p2881_p11 = pnand %p2879_p10, %p2876_p9 }
  0x13   : > { %2884 = shalt.err (!%p2881_p11)
}
  0x14   : > { %s2885_s7 = scalar_lea.vmem %s176_s21, 16384  ;;  %p2893_p1 = scmp.lt.s32.totalorder %s176_s21, %s176_s21 }
  0x15   : > { %p2886_p12 = scmp.ne.s32.totalorder %s176_s21, %s2885_s7  ;;  %p2894_p4 = scmp.lt.s32.totalorder %s2885_s7, %s2885_s7 }
  0x17   : > { %p2888_p13 = pnand %p2886_p12, %p2874_p7  ;;  %p2895_p3 = por %p2894_p4, %p2893_p1 }
  0x19   : > { %p2889_p0 = pneg %p2888_p13 }
  0x1b   : > { %p2896_p2 = pnand %p2895_p3, %p2889_p0 }
  0x1d   : > { %2899 = shalt.err (!%p2896_p2)
}
  0x1e   : > { %s2913_s8 = smov 256   ;;  %s2914_s9 = smov 16  }
  0x1f   : > { %2653 = dma.hbm_to_vmem [thread:$0]  (!%p2968_p5), %s3344_s3, 16384, %s176_s21, [#allocation3], %s2913_s8, %s2913_s8, %s2914_s9  }
  0x20   : > { %p3353_p6 = scmp.ne.s32.totalorder %s3350_s22, 0 }
  0x21   : > { %p3354_p8 = scmp.ne.s32.totalorder (!%p3353_p6), %s3351_s23, 0 }
  0x22   : > { %203 = sbr.rel (%p3353_p6) target bundleno = 616 (0x268), region = 40 }
  0x29   : > { %2905 = dma.done.wait (%p3354_p8), [#allocation3], 16384  }
  0x2a   : > { %2907 = vsyncadd (%p3354_p8), [#allocation3], 4294950912  ;;  %s2294_s12 = sshll.u32 %s2287_s19, 4  ;;  %v2915_v0 = vmov 0   ;;  %v2668_v1 = vld [vmem:[%s3342_s1 + $0x4] ss:$16 sps:$4 sm:$0xff]  }
  0x2b   : > { %397 = vmatprep.mubr.bf16.mxu0 %v2915_v0  ;;  %p233_p2 = scmp.lt.s32.totalorder %s2294_s12, 31  ;;  %510 = vmatprep.mubr.bf16.mxu1 %v2915_v0  ;;  %v2670_v2 = vld [vmem:[%s3342_s1] ss:$16 sps:$4 sm:$0xff]   ;;  %v2671_v3 = vld [vmem:[%s3342_s1 + $0x24] ss:$16 sps:$4 sm:$0xff]   ;;  %vm340_vm0 = vcmask 261120  }
  0x2c   : > { %365 = vmatprep.subr.bf16.mxu0 %v2668_v1  ;;  %v2673_v4 = vld [vmem:[%s3342_s1 + $0x20] ss:$16 sps:$4 sm:$0xff]   ;;  %v2674_v8 = vld [vmem:[%s3342_s1 + $0xc] ss:$16 sps:$4 sm:$0xff]   ;;  %v2676_v9 = vld [vmem:[%s3342_s1 + $0x8] ss:$16 sps:$4 sm:$0xff]  }
  0x2d   : > { %s3356_s12 = smov (!%p233_p2, %s2294_s12), 31  ;;  %366 = vmatpush1.bf16.msra.mxu0 %v2670_v2  ;;  %478 = vmatprep.subr.bf16.mxu1 %v2674_v8  ;;  %v2677_v12 = vld [vmem:[%s3342_s1 + $0x2c] ss:$16 sps:$4 sm:$0xff]   ;;  %v2679_v13 = vld [vmem:[%s3342_s1 + $0x28] ss:$16 sps:$4 sm:$0xff]  }
  0x2e   : > { %s2295_s13 = sshll.u32 %s3356_s12, 3  ;;  %367 = vmatprep.subr.bf16.mxu0 %v2671_v3  ;;  %479 = vmatpush1.bf16.msra.mxu1 %v2676_v9  ;;  %v2680_v14 = vld [vmem:[#allocation2] ss:$16 sps:$4 sm:$0xff]   ;;  %v2682_v15 = vld [vmem:[#allocation2 + $0x4] ss:$16 sps:$4 sm:$0xff]   ;;  %s2485_s14 = sshll.u32 %s3356_s12, 4 }
  0x2f   : > { %s3007_s20 = scalar_lea.vmem %s3341_s0, %s2295_s13  ;;  %480 = vmatprep.subr.bf16.mxu1 %v2677_v12  ;;  %v2685_v16 = vld [vmem:[#allocation2 + $0xc] ss:$16 sps:$4 sm:$0xff]   ;;  %v2688_v18 = vld [vmem:[#allocation2 + $0x24] ss:$16 sps:$4 sm:$0xff]   ;;  %v2683_v19 = vld [vmem:[#allocation2 + $0x8] ss:$16 sps:$4 sm:$0xff]   ;;  %s3248_s16 = scalar_lea.vmem %s3346_s5, %s2485_s14 }
  0x30   : > { %v246_v5 = vld [vmem:[%s3007_s20] sm:$0xff]  ;;  %v247_v6 = vld [vmem:[%s3007_s20 + $0x8] sm:$0xff]  ;;  %v248_v10 = vld [vmem:[%s3007_s20 + $0x10] sm:$0xff] }
  0x31   : > { %v262_v7 = vpack.c.bf16 %v247_v6, %v246_v5  ;;  %368 = vmatpush1.bf16.msra.mxu0 %v2673_v4  ;;  %v249_v11 = vld [vmem:[%s3007_s20 + $0x18] sm:$0xff]  ;;  %v2686_v20 = vld [vmem:[#allocation2 + $0x20] ss:$16 sps:$4 sm:$0xff]   ;;  %v2694_v22 = vld [vmem:[#allocation2 + $0x44] ss:$16 sps:$4 sm:$0xff]  }
  0x32   : > { %1477 = vmatprep.subr.bf16.mxu0 %v2682_v15  ;;  %v263_v17 = vpack.c.bf16 %v249_v11, %v248_v10  ;;  %481 = vmatpush1.bf16.msra.mxu1 %v2679_v13  ;;  %v2691_v21 = vld [vmem:[#allocation2 + $0x2c] ss:$16 sps:$4 sm:$0xff]   ;;  %v250_v23 = vld [vmem:[%s3007_s20 + $0x20] sm:$0xff]  ;;  %v2689_v25 = vld [vmem:[#allocation2 + $0x28] ss:$16 sps:$4 sm:$0xff]  }
  0x33   : > { %1703 = vmatprep.subr.bf16.mxu1 %v2685_v16  ;;  %v251_v24 = vld [vmem:[%s3007_s20 + $0x28] sm:$0xff]  ;;  %v2692_v26 = vld [vmem:[#allocation2 + $0x40] ss:$16 sps:$4 sm:$0xff]   ;;  %v2700_v28 = vld [vmem:[#allocation2 + $0x64] ss:$16 sps:$4 sm:$0xff]  }
  0x34   : > { %2307 = vmatmul.mubr.msk.bf16.vlgmr.msra.gmra.mrb[0].mxu0 %vm340_vm0, %v262_v7  ;;  %v2697_v27 = vld [vmem:[#allocation2 + $0x4c] ss:$16 sps:$4 sm:$0xff]   ;;  %v264_v29 = vpack.c.bf16 %v251_v24, %v250_v23  ;;  %v2695_v30 = vld [vmem:[#allocation2 + $0x48] ss:$16 sps:$4 sm:$0xff]   ;;  %v2698_v31 = vld [vmem:[#allocation2 + $0x60] ss:$16 sps:$4 sm:$0xff]  }
  0x35   : > { %407 = vmatprep.mubr.bf16.mxu0 %v2915_v0  ;;  %1478 = vmatpush1.bf16.msra.mxu0 %v2680_v14  ;;  %v2703_v32 = vld [vmem:[#allocation2 + $0x6c] ss:$16 sps:$4 sm:$0xff]   ;;  %v2706_v33 = vld [vmem:[#allocation2 + $0x84] ss:$16 sps:$4 sm:$0xff]   ;;  %v2701_v36 = vld [vmem:[#allocation2 + $0x68] ss:$16 sps:$4 sm:$0xff]  }
  0x36   : > { %1479 = vmatprep.subr.bf16.mxu0 %v2688_v18  ;;  %2315 = vmatmul.mubr.msk.bf16.vlgmr.msra.gmra.mrb[0].mxu1 %vm340_vm0, %v262_v7  ;;  %v252_v34 = vld [vmem:[%s3007_s20 + $0x30] sm:$0xff]  ;;  %v253_v35 = vld [vmem:[%s3007_s20 + $0x38] sm:$0xff]  ;;  %v254_v45 = vld [vmem:[%s3007_s20 + $0x40] sm:$0xff] }
  0x37   : > { %520 = vmatprep.mubr.bf16.mxu1 %v2915_v0  ;;  %1704 = vmatpush1.bf16.msra.mxu1 %v2683_v19  ;;  %v2704_v37 = vld [vmem:[#allocation2 + $0x80] ss:$16 sps:$4 sm:$0xff]   ;;  %v2709_v38 = vld [vmem:[#allocation2 + $0x8c] ss:$16 sps:$4 sm:$0xff]   ;;  %v2712_v39 = vld [vmem:[#allocation2 + $0xa4] ss:$16 sps:$4 sm:$0xff]   ;;  %v265_v40 = vpack.c.bf16 %v253_v35, %v252_v34  ;;  %v280_v35 = vlaneseq }
  0x38   : > { %1705 = vmatprep.subr.bf16.mxu1 %v2691_v21  ;;  %v2707_v41 = vld [vmem:[#allocation2 + $0x88] ss:$16 sps:$4 sm:$0xff]   ;;  %v2710_v42 = vld [vmem:[#allocation2 + $0xa0] ss:$16 sps:$4 sm:$0xff]   ;;  %v2715_v43 = vld [vmem:[#allocation2 + $0xac] ss:$16 sps:$4 sm:$0xff]  }
  0x39   : > { %1480 = vmatpush1.bf16.msra.mxu0 %v2686_v20  ;;  %v2718_v44 = vld [vmem:[#allocation2 + $0xc4] ss:$16 sps:$4 sm:$0xff]   ;;  %v255_v46 = vld [vmem:[%s3007_s20 + $0x48] sm:$0xff]  ;;  %v2716_v48 = vld [vmem:[#allocation2 + $0xc0] ss:$16 sps:$4 sm:$0xff]  }
  0x3a   : > { %1481 = vmatprep.subr.bf16.mxu0 %v2694_v22  ;;  %v2713_v47 = vld [vmem:[#allocation2 + $0xa8] ss:$16 sps:$4 sm:$0xff]   ;;  %v2721_v49 = vld [vmem:[#allocation2 + $0xcc] ss:$16 sps:$4 sm:$0xff]   ;;  %v2724_v50 = vld [vmem:[#allocation2 + $0xe4] ss:$16 sps:$4 sm:$0xff]   ;;  %v266_v51 = vpack.c.bf16 %v255_v46, %v254_v45 }
  0x3b   : > { %1706 = vmatpush1.bf16.msra.mxu1 %v2689_v25  ;;  %v2719_v52 = vld [vmem:[#allocation2 + $0xc8] ss:$16 sps:$4 sm:$0xff]   ;;  %v2722_v53 = vld [vmem:[#allocation2 + $0xe0] ss:$16 sps:$4 sm:$0xff]   ;;  %v2727_v54 = vld [vmem:[#allocation2 + $0xec] ss:$16 sps:$4 sm:$0xff]  }
  0x3c   : > { %2308 = vmatmul.mubr.msk.bf16.gmra.mrb[4].mxu0 %vm340_vm0, %v263_v17  ;;  %1707 = vmatprep.subr.bf16.mxu1 %v2697_v27  ;;  %v2730_v55 = vld [vmem:[#allocation2 + $0x104] ss:$16 sps:$4 sm:$0xff]   ;;  %v257_v57 = vld [vmem:[%s3007_s20 + $0x58] sm:$0xff]  ;;  %v2728_v59 = vld [vmem:[#allocation2 + $0x100] ss:$16 sps:$4 sm:$0xff]  }
  0x3d   : > { %417 = vmatprep.mubr.bf16.mxu0 %v2915_v0  ;;  %1482 = vmatpush1.bf16.msra.mxu0 %v2692_v26  ;;  %v256_v56 = vld [vmem:[%s3007_s20 + $0x50] sm:$0xff]  ;;  %v2725_v58 = vld [vmem:[#allocation2 + $0xe8] ss:$16 sps:$4 sm:$0xff]   ;;  %v2733_v60 = vld [vmem:[#allocation2 + $0x10c] ss:$16 sps:$4 sm:$0xff]  }
  0x3e   : > { %1483 = vmatprep.subr.bf16.mxu0 %v2700_v28  ;;  %2316 = vmatmul.mubr.msk.bf16.gmra.mrb[4].mxu1 %vm340_vm0, %v263_v17  ;;  %v2736_v61 = vld [vmem:[#allocation2 + $0x124] ss:$16 sps:$4 sm:$0xff]   ;;  %v267_v62 = vpack.c.bf16 %v257_v57, %v256_v56  ;;  %v2731_v63 = vld [vmem:[#allocation2 + $0x108] ss:$16 sps:$4 sm:$0xff]   ;;  %v2734_v1 = vld [vmem:[#allocation2 + $0x120] ss:$16 sps:$4 sm:$0xff]  }
  0x3f   : > { %530 = vmatprep.mubr.bf16.mxu1 %v2915_v0  ;;  %1708 = vmatpush1.bf16.msra.mxu1 %v2695_v30  ;;  %v2739_v2 = vld [vmem:[#allocation2 + $0x12c] ss:$16 sps:$4 sm:$0xff]   ;;  %v2742_v3 = vld [vmem:[#allocation2 + $0x144] ss:$16 sps:$4 sm:$0xff]   ;;  %v2737_v6 = vld [vmem:[#allocation2 + $0x128] ss:$16 sps:$4 sm:$0xff]  }
  0x40   : > { %1709 = vmatprep.subr.bf16.mxu1 %v2703_v32  ;;  %v258_v4 = vld [vmem:[%s3007_s20 + $0x60] sm:$0xff]  ;;  %v259_v5 = vld [vmem:[%s3007_s20 + $0x68] sm:$0xff]  ;;  %v260_v15 = vld [vmem:[%s3007_s20 + $0x70] sm:$0xff] }
  0x41   : > { %1484 = vmatpush1.bf16.msra.mxu0 %v2698_v31  ;;  %v2740_v7 = vld [vmem:[#allocation2 + $0x140] ss:$16 sps:$4 sm:$0xff]   ;;  %v2745_v8 = vld [vmem:[#allocation2 + $0x14c] ss:$16 sps:$4 sm:$0xff]   ;;  %v2748_v9 = vld [vmem:[#allocation2 + $0x164] ss:$16 sps:$4 sm:$0xff]   ;;  %v268_v10 = vpack.c.bf16 %v259_v5, %v258_v4 }
  0x42   : > { %1485 = vmatprep.subr.bf16.mxu0 %v2706_v33  ;;  %v2743_v11 = vld [vmem:[#allocation2 + $0x148] ss:$16 sps:$4 sm:$0xff]   ;;  %v2746_v12 = vld [vmem:[#allocation2 + $0x160] ss:$16 sps:$4 sm:$0xff]   ;;  %v2751_v13 = vld [vmem:[#allocation2 + $0x16c] ss:$16 sps:$4 sm:$0xff]  }
  0x43   : > { %1710 = vmatpush1.bf16.msra.mxu1 %v2701_v36  ;;  %v2754_v14 = vld [vmem:[#allocation2 + $0x184] ss:$16 sps:$4 sm:$0xff]   ;;  %v261_v16 = vld [vmem:[%s3007_s20 + $0x78] sm:$0xff]  ;;  %v2752_v18 = vld [vmem:[#allocation2 + $0x180] ss:$16 sps:$4 sm:$0xff]   ;;  %v3076_v36 = vshrl.u32 %v280_v35, 7 }
  0x44   : > { %2309 = vmatmul.mubr.msk.bf16.gmra.mrb[8].mxu0 %vm340_vm0, %v264_v29  ;;  %1711 = vmatprep.subr.bf16.mxu1 %v2709_v38  ;;  %v2749_v17 = vld [vmem:[#allocation2 + $0x168] ss:$16 sps:$4 sm:$0xff]   ;;  %v2757_v19 = vld [vmem:[#allocation2 + $0x18c] ss:$16 sps:$4 sm:$0xff]   ;;  %v2760_v20 = vld [vmem:[#allocation2 + $0x1a4] ss:$16 sps:$4 sm:$0xff]   ;;  %v269_v21 = vpack.c.bf16 %v261_v16, %v260_v15 }
  0x45   : > { %427 = vmatprep.mubr.bf16.mxu0 %v2915_v0  ;;  %1486 = vmatpush1.bf16.msra.mxu0 %v2704_v37  ;;  %v2755_v22 = vld [vmem:[#allocation2 + $0x188] ss:$16 sps:$4 sm:$0xff]   ;;  %v2758_v23 = vld [vmem:[#allocation2 + $0x1a0] ss:$16 sps:$4 sm:$0xff]   ;;  %v2763_v24 = vld [vmem:[#allocation2 + $0x1ac] ss:$16 sps:$4 sm:$0xff]  }
  0x46   : > { %1487 = vmatprep.subr.bf16.mxu0 %v2712_v39  ;;  %2317 = vmatmul.mubr.msk.bf16.gmra.mrb[8].mxu1 %vm340_vm0, %v264_v29  ;;  %v2761_v25 = vld [vmem:[#allocation2 + $0x1a8] ss:$16 sps:$4 sm:$0xff]   ;;  %v2766_v26 = vld [vmem:[#allocation2 + $0x1c4] ss:$16 sps:$4 sm:$0xff]   ;;  %v2769_v27 = vld [vmem:[#allocation2 + $0x1cc] ss:$16 sps:$4 sm:$0xff]  }
  0x47   : > { %540 = vmatprep.mubr.bf16.mxu1 %v2915_v0  ;;  %1712 = vmatpush1.bf16.msra.mxu1 %v2707_v41  ;;  %v2764_v28 = vld [vmem:[#allocation2 + $0x1c0] ss:$16 sps:$4 sm:$0xff]   ;;  %v2767_v29 = vld [vmem:[#allocation2 + $0x1c8] ss:$16 sps:$4 sm:$0xff]   ;;  %v2772_v30 = vld [vmem:[#allocation2 + $0x1e4] ss:$16 sps:$4 sm:$0xff]  }
  0x48   : > { %1713 = vmatprep.subr.bf16.mxu1 %v2715_v43  ;;  %v2775_v31 = vld [vmem:[#allocation2 + $0x1ec] ss:$16 sps:$4 sm:$0xff]   ;;  %v2770_v32 = vld [vmem:[#allocation2 + $0x1e0] ss:$16 sps:$4 sm:$0xff]   ;;  %v2773_v33 = vld [vmem:[#allocation2 + $0x1e8] ss:$16 sps:$4 sm:$0xff]  }
  0x49   : > { %1488 = vmatpush1.bf16.msra.mxu0 %v2710_v42  ;;  %v2781_v34 = vld [vmem:[#allocation2 + $0x20c] ss:$16 sps:$4 sm:$0xff]   ;;  %v282_v37 = vsub.s32 0, %v3076_v36  ;;  %v278_v38 = vld [vmem:[%s3343_s2] sm:$0xf]  ;;  %v286_v39 = vsub.s32 1, %v3076_v36 }
  0x4a   : > { %1489 = vmatprep.subr.bf16.mxu0 %v2718_v44  ;;  %v290_v45 = vsub.s32 2, %v3076_v36  ;;  %v2787_v4 = vld [vmem:[#allocation2 + $0x22c] ss:$16 sps:$4 sm:$0xff]  }
  0x4b   : > { %1714 = vmatpush1.bf16.msra.mxu1 %v2713_v47  ;;  %v3089_v41 = vrot.slane %v278_v38, %v286_v39 }
  0x4c   : > { %2310 = vmatmul.mubr.msk.bf16.gmra.mrb[12].mxu0 %vm340_vm0, %v265_v40  ;;  %1715 = vmatprep.subr.bf16.mxu1 %v2721_v49 }
  0x4d   : > { %437 = vmatprep.mubr.bf16.mxu0 %v2915_v0  ;;  %1490 = vmatpush1.bf16.msra.mxu0 %v2716_v48  ;;  %v294_v48 = vsub.s32 3, %v3076_v36 }
  0x4e   : > { %1491 = vmatprep.subr.bf16.mxu0 %v2724_v50  ;;  %2318 = vmatmul.mubr.msk.bf16.gmra.mrb[12].mxu1 %vm340_vm0, %v265_v40  ;;  %v3085_v40 = vrot.slane %v278_v38, %v282_v37 }
  0x4f   : > { %550 = vmatprep.mubr.bf16.mxu1 %v2915_v0  ;;  %1716 = vmatpush1.bf16.msra.mxu1 %v2719_v52  ;;  %v3103_v57 = vrot.slane %v278_v38, %v294_v48 }
  0x50   : > { %1717 = vmatprep.subr.bf16.mxu1 %v2727_v54  ;;  %v3099_v54 = vrot.slane %v278_v38, %v290_v45 }
  0x51   : > { %1492 = vmatpush1.bf16.msra.mxu0 %v2722_v53 }
  0x52   : > { %1493 = vmatprep.subr.bf16.mxu0 %v2730_v55 }
  0x53   : > { %1718 = vmatpush1.bf16.msra.mxu1 %v2725_v58 }
  0x54   : > { %2311 = vmatmul.mubr.msk.bf16.gmra.mrb[16].mxu0 %vm340_vm0, %v266_v51  ;;  %1719 = vmatprep.subr.bf16.mxu1 %v2733_v60 }
  0x55   : > { %447 = vmatprep.mubr.bf16.mxu0 %v2915_v0  ;;  %1494 = vmatpush1.bf16.msra.mxu0 %v2728_v59 }
  0x56   : > { %1495 = vmatprep.subr.bf16.mxu0 %v2736_v61  ;;  %2319 = vmatmul.mubr.msk.bf16.gmra.mrb[16].mxu1 %vm340_vm0, %v266_v51  ;;  %v2776_v61 = vld [vmem:[#allocation2 + $0x200] ss:$16 sps:$4 sm:$0xff]  }
  0x57   : > { %560 = vmatprep.mubr.bf16.mxu1 %v2915_v0  ;;  %1720 = vmatpush1.bf16.msra.mxu1 %v2731_v63 }
  0x58   : > { %1721 = vmatprep.subr.bf16.mxu1 %v2739_v2 }
  0x59   : > { %1496 = vmatpush1.bf16.msra.mxu0 %v2734_v1 }
  0x5a   : > { %1497 = vmatprep.subr.bf16.mxu0 %v2742_v3  ;;  %v2784_v3 = vld [vmem:[#allocation2 + $0x224] ss:$16 sps:$4 sm:$0xff]  }
  0x5b   : > { %1722 = vmatpush1.bf16.msra.mxu1 %v2737_v6 }
  0x5c   : > { %2312 = vmatmul.mubr.msk.bf16.gmra.mrb[20].mxu0 %vm340_vm0, %v267_v62  ;;  %1723 = vmatprep.subr.bf16.mxu1 %v2745_v8 }
  0x5d   : > { %457 = vmatprep.mubr.bf16.mxu0 %v2915_v0  ;;  %1498 = vmatpush1.bf16.msra.mxu0 %v2740_v7 }
  0x5e   : > { %1499 = vmatprep.subr.bf16.mxu0 %v2748_v9  ;;  %2320 = vmatmul.mubr.msk.bf16.gmra.mrb[20].mxu1 %vm340_vm0, %v267_v62  ;;  %v2779_v62 = vld [vmem:[#allocation2 + $0x208] ss:$16 sps:$4 sm:$0xff]  }
  0x5f   : > { %570 = vmatprep.mubr.bf16.mxu1 %v2915_v0  ;;  %1724 = vmatpush1.bf16.msra.mxu1 %v2743_v11 }
  0x60   : > { %1725 = vmatprep.subr.bf16.mxu1 %v2751_v13  ;;  %v2782_v13 = vld [vmem:[#allocation2 + $0x220] ss:$16 sps:$4 sm:$0xff]  }
  0x61   : > { %1500 = vmatpush1.bf16.msra.mxu0 %v2746_v12 }
  0x62   : > { %1501 = vmatprep.subr.bf16.mxu0 %v2754_v14 }
  0x63   : > { %1726 = vmatpush1.bf16.msra.mxu1 %v2749_v17 }
  0x64   : > { %2313 = vmatmul.mubr.msk.bf16.gmra.mrb[24].mxu0 %vm340_vm0, %v268_v10  ;;  %1727 = vmatprep.subr.bf16.mxu1 %v2757_v19  ;;  %v2790_v19 = vld [vmem:[#allocation2 + $0x244] ss:$16 sps:$4 sm:$0xff]  }
  0x65   : > { %467 = vmatprep.mubr.bf16.mxu0 %v2915_v0  ;;  %1502 = vmatpush1.bf16.msra.mxu0 %v2752_v18  ;;  %v2785_v18 = vld [vmem:[#allocation2 + $0x228] ss:$16 sps:$4 sm:$0xff]  }
  0x66   : > { %1503 = vmatprep.subr.bf16.mxu0 %v2760_v20  ;;  %2321 = vmatmul.mubr.msk.bf16.gmra.mrb[24].mxu1 %vm340_vm0, %v268_v10 }
  0x67   : > { %580 = vmatprep.mubr.bf16.mxu1 %v2915_v0  ;;  %1728 = vmatpush1.bf16.msra.mxu1 %v2755_v22  ;;  %v2778_v0 = vld [vmem:[#allocation2 + $0x204] ss:$16 sps:$4 sm:$0xff]  }
  0x68   : > { %1729 = vmatprep.subr.bf16.mxu1 %v2763_v24  ;;  %v2793_v24 = vld [vmem:[#allocation2 + $0x24c] ss:$16 sps:$4 sm:$0xff]  }
  0x69   : > { %1504 = vmatpush1.bf16.msra.mxu0 %v2758_v23 }
  0x6a   : > { %1505 = vmatprep.subr.bf16.mxu0 %v2766_v26 }
  0x6b   : > { %1730 = vmatpush1.bf16.msra.mxu1 %v2761_v25 }
  0x6c   : > { %2314 = vmatmul.mubr.msk.bf16.gmra.mrb[28].mxu0 %vm340_vm0, %v269_v21  ;;  %1731 = vmatprep.subr.bf16.mxu1 %v2769_v27 }
  0x6d   : > { %1506 = vmatpush1.bf16.msra.mxu0 %v2764_v28 }
  0x6e   : > { %2322 = vmatmul.mubr.msk.bf16.gmra.mrb[28].mxu1 %vm340_vm0, %v269_v21  ;;  %1507 = vmatprep.subr.bf16.mxu0 %v2772_v30 }
  0x6f   : > { %1732 = vmatpush1.bf16.msra.mxu1 %v2767_v29 }
  0x70   : > { %1733 = vmatprep.subr.bf16.mxu1 %v2775_v31 }
  0x71   : > { %1508 = vmatpush1.bf16.msra.mxu0 %v2770_v32 }
  0x72   : > { %1590 = vmatprep.subr.bf16.mxu0 %v2778_v0  ;;  %v2791_v0 = vld [vmem:[#allocation2 + $0x248] ss:$16 sps:$4 sm:$0xff]  }
  0x73   : > { %1734 = vmatpush1.bf16.msra.mxu1 %v2773_v33  ;;  %v2788_v33 = vld [vmem:[#allocation2 + $0x240] ss:$16 sps:$4 sm:$0xff]  }
  0x74   : > { %1816 = vmatprep.subr.bf16.mxu1 %v2781_v34 }
 0x107   : > { %v399_v42 = vpop.f32.mrb[0].mxu0 }
 0x108   : > { %v400_v43 = vadd.f32 %v399_v42, %v3085_v40  ;;  %v401_v44 = vpop.f32.mrb[1].mxu0 }
 0x109   : > { %v402_v46 = vadd.f32 %v401_v44, %v3089_v41  ;;  %v403_v47 = vpop.f32.mrb[2].mxu0  ;;  %v512_v63 = vpop.f32.mrb[0].mxu1  ;;  %v2799_v44 = vld [vmem:[#allocation2 + $0x26c] ss:$16 sps:$4 sm:$0xff]  }
 0x10a   : > { %v404_v49 = vadd.f32 %v403_v47, %v3085_v40  ;;  %v405_v50 = vpop.f32.mrb[3].mxu0  ;;  %v591_v52 = vmax.f32 %v400_v43, 0.0  ;;  %v513_v5 = vadd.f32 %v512_v63, %v3099_v54  ;;  %v514_v6 = vpop.f32.mrb[1].mxu1  ;;  %v2796_v43 = vld [vmem:[#allocation2 + $0x264] ss:$16 sps:$4 sm:$0xff]  }
 0x10b   : > { %v406_v51 = vadd.f32 %v405_v50, %v3089_v41  ;;  %v592_v55 = vmax.f32 %v402_v46, 0.0  ;;  %v515_v9 = vadd.f32 %v514_v6, %v3103_v57  ;;  %v516_v10 = vpop.f32.mrb[2].mxu1  ;;  %v2802_v63 = vld [vmem:[#allocation2 + $0x284] ss:$16 sps:$4 sm:$0xff]  }
 0x10c   : > { %v595_v53 = vmax.f32 %v404_v49, 0.0  ;;  %v593_v14 = vmax.f32 %v513_v5, 0.0  ;;  %v517_v15 = vadd.f32 %v516_v10, %v3099_v54  ;;  %v518_v16 = vpop.f32.mrb[3].mxu1  ;;  %v2805_v5 = vld [vmem:[#allocation2 + $0x28c] ss:$16 sps:$4 sm:$0xff]  }
 0x10d   : > { %v596_v56 = vmax.f32 %v406_v51, 0.0  ;;  %v594_v20 = vmax.f32 %v515_v9, 0.0  ;;  %v519_v21 = vadd.f32 %v518_v16, %v3103_v57 }
 0x10e   : > { %v655_v58 = vpack.c.bf16 %v595_v53, %v591_v52  ;;  %v597_v25 = vmax.f32 %v517_v15, 0.0  ;;  %v2803_v15 = vld [vmem:[#allocation2 + $0x288] ss:$16 sps:$4 sm:$0xff]  }
 0x10f   : > { %v656_v59 = vpack.c.bf16 %v596_v56, %v592_v55  ;;  %v409_v60 = vpop.f32.mrb[4].mxu0  ;;  %v598_v28 = vmax.f32 %v519_v21, 0.0  ;;  %v2794_v56 = vld [vmem:[#allocation2 + $0x260] ss:$16 sps:$4 sm:$0xff]   ;;  %v2811_v21 = vld [vmem:[#allocation2 + $0x2ac] ss:$16 sps:$4 sm:$0xff]  }
 0x110   : > { %v410_v1 = vadd.f32 %v409_v60, %v3085_v40  ;;  %v411_v2 = vpop.f32.mrb[5].mxu0  ;;  %v3113_v30 = vpack.c.bf16 %v597_v25, %v593_v14  ;;  %v2800_v14 = vld [vmem:[#allocation2 + $0x280] ss:$16 sps:$4 sm:$0xff]  }
 0x111   : > { %v412_v7 = vadd.f32 %v411_v2, %v3089_v41  ;;  %v413_v8 = vpop.f32.mrb[6].mxu0  ;;  %1509 = vmatprep.mubr.bf16.mxu0 %v656_v59  ;;  %1735 = vmatprep.mubr.bf16.mxu1 %v656_v59  ;;  %v3115_v34 = vpack.c.bf16 %v598_v28, %v594_v20  ;;  %v522_v35 = vpop.f32.mrb[4].mxu1  ;;  %v2808_v20 = vld [vmem:[#allocation2 + $0x2a4] ss:$16 sps:$4 sm:$0xff]  }
 0x112   : > { %v414_v11 = vadd.f32 %v413_v8, %v3085_v40  ;;  %v415_v12 = vpop.f32.mrb[7].mxu0  ;;  %1510 = vmatmul.mubr.bf16.vlgmr.msra.gmra.mrb[32].mxu0 %v655_v58  ;;  %1736 = vmatmul.mubr.bf16.vlgmr.msra.gmra.mrb[32].mxu1 %v655_v58  ;;  %v599_v22 = vmax.f32 %v410_v1, 0.0  ;;  %v523_v46 = vadd.f32 %v522_v35, %v3099_v54  ;;  %v524_v47 = vpop.f32.mrb[5].mxu1 }
 0x113   : > { %v416_v17 = vadd.f32 %v415_v12, %v3089_v41  ;;  %1591 = vmatpush1.bf16.msra.mxu0 %v2776_v61  ;;  %1817 = vmatpush1.bf16.msra.mxu1 %v2779_v62  ;;  %v600_v26 = vmax.f32 %v412_v7, 0.0  ;;  %v525_v51 = vadd.f32 %v524_v47, %v3103_v57  ;;  %v526_v52 = vpop.f32.mrb[6].mxu1  ;;  %v2797_v62 = vld [vmem:[#allocation2 + $0x268] ss:$16 sps:$4 sm:$0xff]  }
 0x114   : > { %v603_v23 = vmax.f32 %v414_v11, 0.0  ;;  %1592 = vmatprep.subr.bf16.mxu0 %v2784_v3  ;;  %1818 = vmatprep.subr.bf16.mxu1 %v2787_v4  ;;  %v601_v58 = vmax.f32 %v523_v46, 0.0  ;;  %v527_v59 = vadd.f32 %v526_v52, %v3099_v54  ;;  %v528_v60 = vpop.f32.mrb[7].mxu1 }
 0x115   : > { %v604_v27 = vmax.f32 %v416_v17, 0.0  ;;  %v602_v1 = vmax.f32 %v525_v51, 0.0  ;;  %v529_v2 = vadd.f32 %v528_v60, %v3103_v57  ;;  %v2812_v60 = vld [vmem:[#allocation2 + $0x2c0] ss:$16 sps:$4 sm:$0xff]  }
 0x116   : > { %v659_v29 = vpack.c.bf16 %v603_v23, %v599_v22  ;;  %v605_v6 = vmax.f32 %v527_v59, 0.0 }
 0x117   : > { %v660_v31 = vpack.c.bf16 %v604_v27, %v600_v26  ;;  %1593 = vmatpush1.bf16.msra.mxu0 %v2782_v13  ;;  %1819 = vmatpush1.bf16.msra.mxu1 %v2785_v18  ;;  %v419_v32 = vpop.f32.mrb[8].mxu0  ;;  %v606_v9 = vmax.f32 %v529_v2, 0.0 }
 0x118   : > { %v420_v38 = vadd.f32 %v419_v32, %v3085_v40  ;;  %v421_v42 = vpop.f32.mrb[9].mxu0  ;;  %1594 = vmatprep.subr.bf16.mxu0 %v2790_v19  ;;  %1820 = vmatprep.subr.bf16.mxu1 %v2793_v24  ;;  %v3125_v11 = vpack.c.bf16 %v605_v6, %v601_v58 }
 0x119   : > { %v422_v49 = vadd.f32 %v421_v42, %v3089_v41  ;;  %v423_v50 = vpop.f32.mrb[10].mxu0  ;;  %1519 = vmatprep.mubr.bf16.mxu0 %v660_v31  ;;  %1745 = vmatprep.mubr.bf16.mxu1 %v660_v31  ;;  %v3127_v16 = vpack.c.bf16 %v606_v9, %v602_v1  ;;  %v532_v17 = vpop.f32.mrb[8].mxu1  ;;  %v2806_v31 = vld [vmem:[#allocation2 + $0x2a0] ss:$16 sps:$4 sm:$0xff]   ;;  %v2814_v42 = vld [vmem:[#allocation2 + $0x2c4] ss:$16 sps:$4 sm:$0xff]  }
 0x11a   : > { %v424_v53 = vadd.f32 %v423_v50, %v3085_v40  ;;  %v425_v55 = vpop.f32.mrb[11].mxu0  ;;  %1520 = vmatmul.mubr.bf16.gmra.mrb[36].mxu0 %v659_v29  ;;  %1746 = vmatmul.mubr.bf16.gmra.mrb[36].mxu1 %v659_v29  ;;  %v607_v3 = vmax.f32 %v420_v38, 0.0  ;;  %v533_v22 = vadd.f32 %v532_v17, %v3099_v54  ;;  %v534_v23 = vpop.f32.mrb[9].mxu1  ;;  %v2809_v38 = vld [vmem:[#allocation2 + $0x2a8] ss:$16 sps:$4 sm:$0xff]  }
 0x11b   : > { %v426_v61 = vadd.f32 %v425_v55, %v3089_v41  ;;  %1595 = vmatpush1.bf16.msra.mxu0 %v2788_v33  ;;  %1821 = vmatpush1.bf16.msra.mxu1 %v2791_v0  ;;  %v608_v7 = vmax.f32 %v422_v49, 0.0  ;;  %v535_v26 = vadd.f32 %v534_v23, %v3103_v57  ;;  %v536_v27 = vpop.f32.mrb[10].mxu1  ;;  %v2817_v49 = vld [vmem:[#allocation2 + $0x2cc] ss:$16 sps:$4 sm:$0xff]  }
 0x11c   : > { %v611_v4 = vmax.f32 %v424_v53, 0.0  ;;  %1596 = vmatprep.subr.bf16.mxu0 %v2796_v43  ;;  %1822 = vmatprep.subr.bf16.mxu1 %v2799_v44  ;;  %v609_v32 = vmax.f32 %v533_v22, 0.0  ;;  %v537_v33 = vadd.f32 %v536_v27, %v3099_v54  ;;  %v538_v0 = vpop.f32.mrb[11].mxu1 }
 0x11d   : > { %v612_v8 = vmax.f32 %v426_v61, 0.0  ;;  %v610_v43 = vmax.f32 %v535_v26, 0.0  ;;  %v539_v44 = vadd.f32 %v538_v0, %v3103_v57  ;;  %v2815_v61 = vld [vmem:[#allocation2 + $0x2c8] ss:$16 sps:$4 sm:$0xff]   ;;  %v2829_v26 = vld [vmem:[#allocation2 + $0x30c] ss:$16 sps:$4 sm:$0xff]  }
 0x11e   : > { %v663_v10 = vpack.c.bf16 %v611_v4, %v607_v3  ;;  %v613_v50 = vmax.f32 %v537_v33, 0.0  ;;  %v2820_v3 = vld [vmem:[#allocation2 + $0x2e4] ss:$16 sps:$4 sm:$0xff]   ;;  %v2823_v4 = vld [vmem:[#allocation2 + $0x2ec] ss:$16 sps:$4 sm:$0xff]  }
 0x11f   : > { %v664_v12 = vpack.c.bf16 %v612_v8, %v608_v7  ;;  %1597 = vmatpush1.bf16.msra.mxu0 %v2794_v56  ;;  %1823 = vmatpush1.bf16.msra.mxu1 %v2797_v62  ;;  %v429_v13 = vpop.f32.mrb[12].mxu0  ;;  %v614_v53 = vmax.f32 %v539_v44, 0.0 }
 0x120   : > { %v430_v18 = vadd.f32 %v429_v13, %v3085_v40  ;;  %v431_v19 = vpop.f32.mrb[13].mxu0  ;;  %1598 = vmatprep.subr.bf16.mxu0 %v2802_v63  ;;  %1824 = vmatprep.subr.bf16.mxu1 %v2805_v5  ;;  %v3137_v56 = vpack.c.bf16 %v613_v50, %v609_v32  ;;  %v2835_v50 = vld [vmem:[#allocation2 + $0x32c] ss:$16 sps:$4 sm:$0xff]  }
 0x121   : > { %v432_v24 = vadd.f32 %v431_v19, %v3089_v41  ;;  %v433_v25 = vpop.f32.mrb[14].mxu0  ;;  %1529 = vmatprep.mubr.bf16.mxu0 %v664_v12  ;;  %1755 = vmatprep.mubr.bf16.mxu1 %v664_v12  ;;  %v3139_v62 = vpack.c.bf16 %v614_v53, %v610_v43  ;;  %v542_v63 = vpop.f32.mrb[12].mxu1 }
 0x122   : > { %v434_v28 = vadd.f32 %v433_v25, %v3085_v40  ;;  %v435_v29 = vpop.f32.mrb[15].mxu0  ;;  %1530 = vmatmul.mubr.bf16.gmra.mrb[40].mxu0 %v663_v10  ;;  %1756 = vmatmul.mubr.bf16.gmra.mrb[40].mxu1 %v663_v10  ;;  %v615_v46 = vmax.f32 %v430_v18, 0.0  ;;  %v543_v5 = vadd.f32 %v542_v63, %v3099_v54  ;;  %v544_v6 = vpop.f32.mrb[13].mxu1  ;;  %v2830_v63 = vld [vmem:[#allocation2 + $0x320] ss:$16 sps:$4 sm:$0xff]  }
 0x123   : > { %v436_v35 = vadd.f32 %v435_v29, %v3089_v41  ;;  %1599 = vmatpush1.bf16.msra.mxu0 %v2800_v14  ;;  %1825 = vmatpush1.bf16.msra.mxu1 %v2803_v15  ;;  %v616_v51 = vmax.f32 %v432_v24, 0.0  ;;  %v545_v9 = vadd.f32 %v544_v6, %v3103_v57  ;;  %v546_v10 = vpop.f32.mrb[14].mxu1  ;;  %v2818_v14 = vld [vmem:[#allocation2 + $0x2e0] ss:$16 sps:$4 sm:$0xff]   ;;  %v2838_v6 = vld [vmem:[#allocation2 + $0x344] ss:$16 sps:$4 sm:$0xff]  }
 0x124   : > { %v619_v47 = vmax.f32 %v434_v28, 0.0  ;;  %1600 = vmatprep.subr.bf16.mxu0 %v2808_v20  ;;  %1826 = vmatprep.subr.bf16.mxu1 %v2811_v21  ;;  %v617_v15 = vmax.f32 %v543_v5, 0.0  ;;  %v547_v17 = vadd.f32 %v546_v10, %v3099_v54  ;;  %v548_v18 = vpop.f32.mrb[15].mxu1  ;;  %v2821_v20 = vld [vmem:[#allocation2 + $0x2e8] ss:$16 sps:$4 sm:$0xff]  }
 0x125   : > { %v620_v52 = vmax.f32 %v436_v35, 0.0  ;;  %v2826_v21 = vld [vmem:[#allocation2 + $0x304] ss:$16 sps:$4 sm:$0xff]   ;;  %v618_v22 = vmax.f32 %v545_v9, 0.0  ;;  %v549_v23 = vadd.f32 %v548_v18, %v3103_v57  ;;  %v2833_v5 = vld [vmem:[#allocation2 + $0x328] ss:$16 sps:$4 sm:$0xff]  }
 0x126   : > { %v667_v55 = vpack.c.bf16 %v619_v47, %v615_v46  ;;  %v621_v27 = vmax.f32 %v547_v17, 0.0 }
 0x127   : > { %v668_v58 = vpack.c.bf16 %v620_v52, %v616_v51  ;;  %1601 = vmatpush1.bf16.msra.mxu0 %v2806_v31  ;;  %1827 = vmatpush1.bf16.msra.mxu1 %v2809_v38  ;;  %v439_v59 = vpop.f32.mrb[16].mxu0  ;;  %v622_v31 = vmax.f32 %v549_v23, 0.0  ;;  %v2824_v38 = vld [vmem:[#allocation2 + $0x300] ss:$16 sps:$4 sm:$0xff]   ;;  %v2839_v23 = vld [vmem:[#allocation2 + $0x348] ss:$16 sps:$4 sm:$0xff]  }
 0x128   : > { %v440_v1 = vadd.f32 %v439_v59, %v3085_v40  ;;  %v441_v2 = vpop.f32.mrb[17].mxu0  ;;  %1602 = vmatprep.subr.bf16.mxu0 %v2814_v42  ;;  %1828 = vmatprep.subr.bf16.mxu1 %v2817_v49  ;;  %v3149_v33 = vpack.c.bf16 %v621_v27, %v617_v15  ;;  %v2827_v42 = vld [vmem:[#allocation2 + $0x308] ss:$16 sps:$4 sm:$0xff]   ;;  %v2832_v49 = vld [vmem:[#allocation2 + $0x324] ss:$16 sps:$4 sm:$0xff]  }
 0x129   : > { %v442_v7 = vadd.f32 %v441_v2, %v3089_v41  ;;  %v443_v8 = vpop.f32.mrb[18].mxu0  ;;  %1539 = vmatprep.mubr.bf16.mxu0 %v668_v58  ;;  %1765 = vmatprep.mubr.bf16.mxu1 %v668_v58  ;;  %v3151_v43 = vpack.c.bf16 %v622_v31, %v618_v22  ;;  %v552_v44 = vpop.f32.mrb[16].mxu1  ;;  %v2836_v22 = vld [vmem:[#allocation2 + $0x340] ss:$16 sps:$4 sm:$0xff]  }
 0x12a   : > { %v444_v12 = vadd.f32 %v443_v8, %v3085_v40  ;;  %v445_v13 = vpop.f32.mrb[19].mxu0  ;;  %1540 = vmatmul.mubr.bf16.gmra.mrb[44].mxu0 %v667_v55  ;;  %1766 = vmatmul.mubr.bf16.gmra.mrb[44].mxu1 %v667_v55  ;;  %v623_v24 = vmax.f32 %v440_v1, 0.0  ;;  %v553_v51 = vadd.f32 %v552_v44, %v3099_v54  ;;  %v554_v52 = vpop.f32.mrb[17].mxu1 }
 0x12b   : > { %v446_v19 = vadd.f32 %v445_v13, %v3089_v41  ;;  %1603 = vmatpush1.bf16.msra.mxu0 %v2812_v60  ;;  %1829 = vmatpush1.bf16.msra.mxu1 %v2815_v61  ;;  %v624_v28 = vmax.f32 %v442_v7, 0.0  ;;  %v555_v58 = vadd.f32 %v554_v52, %v3103_v57  ;;  %v556_v59 = vpop.f32.mrb[18].mxu1 }
 0x12c   : > { %v627_v25 = vmax.f32 %v444_v12, 0.0  ;;  %1604 = vmatprep.subr.bf16.mxu0 %v2820_v3  ;;  %1830 = vmatprep.subr.bf16.mxu1 %v2823_v4  ;;  %v625_v1 = vmax.f32 %v553_v51, 0.0  ;;  %v557_v2 = vadd.f32 %v556_v59, %v3099_v54  ;;  %v558_v3 = vpop.f32.mrb[19].mxu1  ;;  %v2841_v12 = vld [vmem:[#allocation2 + $0x34c] ss:$16 sps:$4 sm:$0xff]  }
 0x12d   : > { %v628_v29 = vmax.f32 %v446_v19, 0.0  ;;  %v626_v7 = vmax.f32 %v555_v58, 0.0  ;;  %v559_v8 = vadd.f32 %v558_v3, %v3103_v57 }
 0x12e   : > { %v671_v32 = vpack.c.bf16 %v627_v25, %v623_v24  ;;  %v629_v13 = vmax.f32 %v557_v2, 0.0 }
 0x12f   : > { %v672_v0 = vpack.c.bf16 %v628_v29, %v624_v28  ;;  %1605 = vmatpush1.bf16.msra.mxu0 %v2818_v14  ;;  %1831 = vmatpush1.bf16.msra.mxu1 %v2821_v20  ;;  %v449_v35 = vpop.f32.mrb[20].mxu0  ;;  %v630_v17 = vmax.f32 %v559_v8, 0.0  ;;  %v2844_v28 = vld [vmem:[#allocation2 + $0x364] ss:$16 sps:$4 sm:$0xff]   ;;  %v2847_v29 = vld [vmem:[#allocation2 + $0x36c] ss:$16 sps:$4 sm:$0xff]  }
 0x130   : > { %v450_v46 = vadd.f32 %v449_v35, %v3085_v40  ;;  %v451_v47 = vpop.f32.mrb[21].mxu0  ;;  %1606 = vmatprep.subr.bf16.mxu0 %v2826_v21  ;;  %1832 = vmatprep.subr.bf16.mxu1 %v2829_v26  ;;  %v3161_v19 = vpack.c.bf16 %v629_v13, %v625_v1 }
 0x131   : > { %v452_v53 = vadd.f32 %v451_v47, %v3089_v41  ;;  %v453_v55 = vpop.f32.mrb[22].mxu0  ;;  %1549 = vmatprep.mubr.bf16.mxu0 %v672_v0  ;;  %1775 = vmatprep.mubr.bf16.mxu1 %v672_v0  ;;  %v3163_v24 = vpack.c.bf16 %v630_v17, %v626_v7  ;;  %v562_v25 = vpop.f32.mrb[20].mxu1  ;;  %v2842_v47 = vld [vmem:[#allocation2 + $0x360] ss:$16 sps:$4 sm:$0xff]   ;;  %v2856_v17 = vld [vmem:[#allocation2 + $0x3a4] ss:$16 sps:$4 sm:$0xff]  }
 0x132   : > { %v454_v60 = vadd.f32 %v453_v55, %v3085_v40  ;;  %v455_v61 = vpop.f32.mrb[23].mxu0  ;;  %1550 = vmatmul.mubr.bf16.gmra.mrb[48].mxu0 %v671_v32  ;;  %1776 = vmatmul.mubr.bf16.gmra.mrb[48].mxu1 %v671_v32  ;;  %v631_v9 = vmax.f32 %v450_v46, 0.0  ;;  %v563_v31 = vadd.f32 %v562_v25, %v3099_v54  ;;  %v564_v32 = vpop.f32.mrb[21].mxu1  ;;  %v2850_v55 = vld [vmem:[#allocation2 + $0x384] ss:$16 sps:$4 sm:$0xff]  }
 0x133   : > { %v456_v4 = vadd.f32 %v455_v61, %v3089_v41  ;;  %1607 = vmatpush1.bf16.msra.mxu0 %v2824_v38  ;;  %1833 = vmatpush1.bf16.msra.mxu1 %v2827_v42  ;;  %v632_v14 = vmax.f32 %v452_v53, 0.0  ;;  %v565_v38 = vadd.f32 %v564_v32, %v3103_v57  ;;  %v566_v42 = vpop.f32.mrb[22].mxu1  ;;  %v2845_v53 = vld [vmem:[#allocation2 + $0x368] ss:$16 sps:$4 sm:$0xff]  }
 0x134   : > { %v635_v10 = vmax.f32 %v454_v60, 0.0  ;;  %1608 = vmatprep.subr.bf16.mxu0 %v2832_v49  ;;  %1834 = vmatprep.subr.bf16.mxu1 %v2835_v50  ;;  %v633_v49 = vmax.f32 %v563_v31, 0.0  ;;  %v567_v50 = vadd.f32 %v566_v42, %v3099_v54  ;;  %v568_v51 = vpop.f32.mrb[23].mxu1  ;;  %v2862_v42 = vld [vmem:[#allocation2 + $0x3c4] ss:$16 sps:$4 sm:$0xff]  }
 0x135   : > { %v636_v15 = vmax.f32 %v456_v4, 0.0  ;;  %v634_v58 = vmax.f32 %v565_v38, 0.0  ;;  %v569_v59 = vadd.f32 %v568_v51, %v3103_v57  ;;  %v2857_v38 = vld [vmem:[#allocation2 + $0x3a8] ss:$16 sps:$4 sm:$0xff]  }
 0x136   : > { %v675_v18 = vpack.c.bf16 %v635_v10, %v631_v9  ;;  %v637_v1 = vmax.f32 %v567_v50, 0.0  ;;  %v2848_v9 = vld [vmem:[#allocation2 + $0x380] ss:$16 sps:$4 sm:$0xff]   ;;  %v2851_v10 = vld [vmem:[#allocation2 + $0x388] ss:$16 sps:$4 sm:$0xff]  }
 0x137   : > { %v676_v20 = vpack.c.bf16 %v636_v15, %v632_v14  ;;  %1609 = vmatpush1.bf16.msra.mxu0 %v2830_v63  ;;  %1835 = vmatpush1.bf16.msra.mxu1 %v2833_v5  ;;  %v459_v21 = vpop.f32.mrb[24].mxu0  ;;  %v2853_v63 = vld [vmem:[#allocation2 + $0x38c] ss:$16 sps:$4 sm:$0xff]   ;;  %v638_v4 = vmax.f32 %v569_v59, 0.0  ;;  %v2860_v59 = vld [vmem:[#allocation2 + $0x3c0] ss:$16 sps:$4 sm:$0xff]  }
 0x138   : > { %v460_v26 = vadd.f32 %v459_v21, %v3085_v40  ;;  %v461_v27 = vpop.f32.mrb[25].mxu0  ;;  %1610 = vmatprep.subr.bf16.mxu0 %v2838_v6  ;;  %1836 = vmatprep.subr.bf16.mxu1 %v2841_v12  ;;  %v3173_v6 = vpack.c.bf16 %v637_v1, %v633_v49  ;;  %v2868_v1 = vld [vmem:[#allocation2 + $0x3e4] ss:$16 sps:$4 sm:$0xff]  }
 0x139   : > { %v462_v0 = vadd.f32 %v461_v27, %v3089_v41  ;;  %v463_v35 = vpop.f32.mrb[26].mxu0  ;;  %1559 = vmatprep.mubr.bf16.mxu0 %v676_v20  ;;  %1785 = vmatprep.mubr.bf16.mxu1 %v676_v20  ;;  %v3175_v12 = vpack.c.bf16 %v638_v4, %v634_v58  ;;  %v572_v13 = vpop.f32.mrb[24].mxu1 }
 0x13a   : > { %v464_v44 = vadd.f32 %v463_v35, %v3085_v40  ;;  %v465_v46 = vpop.f32.mrb[27].mxu0  ;;  %1560 = vmatmul.mubr.bf16.gmra.mrb[52].mxu0 %v675_v18  ;;  %1786 = vmatmul.mubr.bf16.gmra.mrb[52].mxu1 %v675_v18  ;;  %v639_v60 = vmax.f32 %v460_v26, 0.0  ;;  %v2859_v18 = vld [vmem:[#allocation2 + $0x3ac] ss:$16 sps:$4 sm:$0xff]   ;;  %v573_v20 = vadd.f32 %v572_v13, %v3099_v54  ;;  %v574_v21 = vpop.f32.mrb[25].mxu1 }
 0x13b   : > { %v466_v52 = vadd.f32 %v465_v46, %v3089_v41  ;;  %1611 = vmatpush1.bf16.msra.mxu0 %v2836_v22  ;;  %1837 = vmatpush1.bf16.msra.mxu1 %v2839_v23  ;;  %v640_v2 = vmax.f32 %v462_v0, 0.0  ;;  %v575_v25 = vadd.f32 %v574_v21, %v3103_v57  ;;  %v576_v26 = vpop.f32.mrb[26].mxu1  ;;  %v2866_v13 = vld [vmem:[#allocation2 + $0x3e0] ss:$16 sps:$4 sm:$0xff]  }
 0x13c   : > { %v643_v61 = vmax.f32 %v464_v44, 0.0  ;;  %1612 = vmatprep.subr.bf16.mxu0 %v2844_v28  ;;  %1838 = vmatprep.subr.bf16.mxu1 %v2847_v29  ;;  %v2854_v29 = vld [vmem:[#allocation2 + $0x3a0] ss:$16 sps:$4 sm:$0xff]   ;;  %v641_v31 = vmax.f32 %v573_v20, 0.0  ;;  %v577_v32 = vadd.f32 %v576_v26, %v3099_v54  ;;  %v578_v0 = vpop.f32.mrb[27].mxu1 }
 0x13d   : > { %v644_v3 = vmax.f32 %v466_v52, 0.0  ;;  %v642_v44 = vmax.f32 %v575_v25, 0.0  ;;  %v579_v46 = vadd.f32 %v578_v0, %v3103_v57 }
 0x13e   : > { %v679_v5 = vpack.c.bf16 %v643_v61, %v639_v60  ;;  %v645_v50 = vmax.f32 %v577_v32, 0.0  ;;  %v2863_v60 = vld [vmem:[#allocation2 + $0x3c8] ss:$16 sps:$4 sm:$0xff]  }
 0x13f   : > { %v680_v7 = vpack.c.bf16 %v644_v3, %v640_v2  ;;  %1613 = vmatpush1.bf16.msra.mxu0 %v2842_v47  ;;  %1839 = vmatpush1.bf16.msra.mxu1 %v2845_v53  ;;  %v469_v8 = vpop.f32.mrb[28].mxu0  ;;  %v646_v53 = vmax.f32 %v579_v46, 0.0  ;;  %v2871_v2 = vld [vmem:[#allocation2 + $0x3ec] ss:$16 sps:$4 sm:$0xff]  }
 0x140   : > { %v470_v14 = vadd.f32 %v469_v8, %v3085_v40  ;;  %v471_v15 = vpop.f32.mrb[29].mxu0  ;;  %1614 = vmatprep.subr.bf16.mxu0 %v2850_v55  ;;  %1840 = vmatprep.subr.bf16.mxu1 %v2853_v63  ;;  %v3185_v58 = vpack.c.bf16 %v645_v50, %v641_v31 }
 0x141   : > { %v472_v22 = vadd.f32 %v471_v15, %v3089_v41  ;;  %v473_v23 = vpop.f32.mrb[30].mxu0  ;;  %1569 = vmatprep.mubr.bf16.mxu0 %v680_v7  ;;  %1795 = vmatprep.mubr.bf16.mxu1 %v680_v7  ;;  %v682_v61 = vpack.c.bf16 %v646_v53, %v642_v44  ;;  %v582_v63 = vpop.f32.mrb[28].mxu1 }
 0x142   : > { %v474_v27 = vadd.f32 %v473_v23, %v3085_v40  ;;  %v475_v28 = vpop.f32.mrb[31].mxu0  ;;  %1570 = vmatmul.mubr.bf16.gmra.mrb[56].mxu0 %v679_v5  ;;  %1796 = vmatmul.mubr.bf16.gmra.mrb[56].mxu1 %v679_v5  ;;  %v647_v47 = vmax.f32 %v470_v14, 0.0  ;;  %v2865_v40 = vld [vmem:[#allocation2 + $0x3cc] ss:$16 sps:$4 sm:$0xff]   ;;  %v583_v3 = vadd.f32 %v582_v63, %v3099_v54  ;;  %v584_v4 = vpop.f32.mrb[29].mxu1 }
 0x143   : > { %v476_v35 = vadd.f32 %v475_v28, %v3089_v41  ;;  %1615 = vmatpush1.bf16.msra.mxu0 %v2848_v9  ;;  %1841 = vmatpush1.bf16.msra.mxu1 %v2851_v10  ;;  %v648_v51 = vmax.f32 %v472_v22, 0.0  ;;  %v585_v5 = vadd.f32 %v584_v4, %v3103_v57  ;;  %v586_v7 = vpop.f32.mrb[30].mxu1  ;;  %v2869_v14 = vld [vmem:[#allocation2 + $0x3e8] ss:$16 sps:$4 sm:$0xff]  }
 0x144   : > { %v651_v49 = vmax.f32 %v474_v27, 0.0  ;;  %1616 = vmatprep.subr.bf16.mxu0 %v2856_v17  ;;  %1842 = vmatprep.subr.bf16.mxu1 %v2859_v18  ;;  %v649_v8 = vmax.f32 %v583_v3, 0.0  ;;  %v587_v9 = vadd.f32 %v586_v7, %v3099_v54  ;;  %v588_v10 = vpop.f32.mrb[31].mxu1 }
 0x145   : > { %v652_v52 = vmax.f32 %v476_v35, 0.0  ;;  %v650_v15 = vmax.f32 %v585_v5, 0.0  ;;  %v589_v17 = vadd.f32 %v588_v10, %v3103_v57  ;;  %v815_v57 = vld [vmem:[%s3345_s4] sm:$0xf] }
 0x146   : > { %v683_v55 = vpack.c.bf16 %v651_v49, %v647_v47  ;;  %v653_v18 = vmax.f32 %v587_v9, 0.0 }
 0x147   : > { %v684_v41 = vpack.c.bf16 %v652_v52, %v648_v51  ;;  %1617 = vmatpush1.bf16.msra.mxu0 %v2854_v29  ;;  %1843 = vmatpush1.bf16.msra.mxu1 %v2857_v38  ;;  %v654_v20 = vmax.f32 %v589_v17, 0.0 }
 0x148   : > { %1618 = vmatprep.subr.bf16.mxu0 %v2862_v42  ;;  %1844 = vmatprep.subr.bf16.mxu1 %v2865_v40  ;;  %v685_v21 = vpack.c.bf16 %v653_v18, %v649_v8 }
 0x149   : > { %1579 = vmatprep.mubr.bf16.mxu0 %v684_v41  ;;  %1805 = vmatprep.mubr.bf16.mxu1 %v684_v41  ;;  %v686_v54 = vpack.c.bf16 %v654_v20, %v650_v15 }
 0x14a   : > { %1580 = vmatmul.mubr.bf16.gmra.mrb[60].mxu0 %v683_v55  ;;  %1806 = vmatmul.mubr.bf16.gmra.mrb[60].mxu1 %v683_v55 }
 0x14b   : > { %1619 = vmatpush1.bf16.msra.mxu0 %v2860_v59  ;;  %1845 = vmatpush1.bf16.msra.mxu1 %v2863_v60 }
 0x14c   : > { %1620 = vmatprep.subr.bf16.mxu0 %v2868_v1  ;;  %1846 = vmatprep.subr.bf16.mxu1 %v2871_v2 }
 0x14d   : > { %1622 = vmatprep.mubr.bf16.mxu0 %v3115_v34  ;;  %1848 = vmatprep.mubr.bf16.mxu1 %v3115_v34  ;;  %v3226_v34 = vrot.slane %v815_v57, %v290_v45 }
 0x14f   : > { %1621 = vmatpush1.bf16.msra.mxu0 %v2866_v13  ;;  %1847 = vmatpush1.bf16.msra.mxu1 %v2869_v14 }
 0x152   : > { %1623 = vmatmul.mubr.bf16.vlgmr.msra.gmra.mrb[32].mxu0 %v3113_v30  ;;  %1849 = vmatmul.mubr.bf16.vlgmr.msra.gmra.mrb[32].mxu1 %v3113_v30  ;;  %v3222_v30 = vrot.slane %v815_v57, %v282_v37 }
 0x153   : > { %1632 = vmatprep.mubr.bf16.mxu0 %v3127_v16  ;;  %1858 = vmatprep.mubr.bf16.mxu1 %v3127_v16  ;;  %v3234_v16 = vrot.slane %v815_v57, %v294_v48 }
 0x15a   : > { %1633 = vmatmul.mubr.bf16.gmra.mrb[36].mxu0 %v3125_v11  ;;  %1859 = vmatmul.mubr.bf16.gmra.mrb[36].mxu1 %v3125_v11  ;;  %v3230_v11 = vrot.slane %v815_v57, %v286_v39 }
 0x15b   : > { %1642 = vmatprep.mubr.bf16.mxu0 %v3139_v62  ;;  %1868 = vmatprep.mubr.bf16.mxu1 %v3139_v62 }
 0x162   : > { %1643 = vmatmul.mubr.bf16.gmra.mrb[40].mxu0 %v3137_v56  ;;  %1869 = vmatmul.mubr.bf16.gmra.mrb[40].mxu1 %v3137_v56 }
 0x163   : > { %1652 = vmatprep.mubr.bf16.mxu0 %v3151_v43  ;;  %1878 = vmatprep.mubr.bf16.mxu1 %v3151_v43 }
 0x16a   : > { %1653 = vmatmul.mubr.bf16.gmra.mrb[44].mxu0 %v3149_v33  ;;  %1879 = vmatmul.mubr.bf16.gmra.mrb[44].mxu1 %v3149_v33 }
 0x16b   : > { %1662 = vmatprep.mubr.bf16.mxu0 %v3163_v24  ;;  %1888 = vmatprep.mubr.bf16.mxu1 %v3163_v24 }
 0x172   : > { %1663 = vmatmul.mubr.bf16.gmra.mrb[48].mxu0 %v3161_v19  ;;  %1889 = vmatmul.mubr.bf16.gmra.mrb[48].mxu1 %v3161_v19 }
 0x173   : > { %1672 = vmatprep.mubr.bf16.mxu0 %v3175_v12  ;;  %1898 = vmatprep.mubr.bf16.mxu1 %v3175_v12 }
 0x17a   : > { %1673 = vmatmul.mubr.bf16.gmra.mrb[52].mxu0 %v3173_v6  ;;  %1899 = vmatmul.mubr.bf16.gmra.mrb[52].mxu1 %v3173_v6 }
 0x17b   : > { %1682 = vmatprep.mubr.bf16.mxu0 %v682_v61  ;;  %1908 = vmatprep.mubr.bf16.mxu1 %v682_v61 }
 0x182   : > { %1683 = vmatmul.mubr.bf16.gmra.mrb[56].mxu0 %v3185_v58  ;;  %1909 = vmatmul.mubr.bf16.gmra.mrb[56].mxu1 %v3185_v58 }
 0x183   : > { %1692 = vmatprep.mubr.bf16.mxu0 %v686_v54  ;;  %1918 = vmatprep.mubr.bf16.mxu1 %v686_v54 }
 0x18a   : > { %1693 = vmatmul.mubr.bf16.gmra.mrb[60].mxu0 %v685_v21  ;;  %1919 = vmatmul.mubr.bf16.gmra.mrb[60].mxu1 %v685_v21 }
 0x225   : > { %v1624_v56 = vpop.f32.mrb[32].mxu0  ;;  %v1850_v62 = vpop.f32.mrb[32].mxu1 }
 0x226   : > { %v2518_v33 = vadd.f32 %v1624_v56, %v3222_v30  ;;  %v2550_v43 = vadd.f32 %v1850_v62, %v3226_v34  ;;  %v1626_v37 = vpop.f32.mrb[33].mxu0  ;;  %v1852_v19 = vpop.f32.mrb[33].mxu1 }
 0x227   : > { %v2519_v45 = vadd.f32 %v1626_v37, %v3230_v11  ;;  %v2551_v24 = vadd.f32 %v1852_v19, %v3234_v16  ;;  %v1628_v6 = vpop.f32.mrb[34].mxu0  ;;  %v1854_v39 = vpop.f32.mrb[34].mxu1 }
 0x228   : > { %v1929_v12 = vmax.f32 %v2518_v33, 0.0  ;;  %v1931_v22 = vmax.f32 %v2550_v43, 0.0  ;;  %v2520_v36 = vadd.f32 %v1628_v6, %v3222_v30  ;;  %v2552_v48 = vadd.f32 %v1854_v39, %v3226_v34  ;;  %v1630_v23 = vpop.f32.mrb[35].mxu0  ;;  %v1856_v25 = vpop.f32.mrb[35].mxu1 }
 0x229   : > { %v1930_v26 = vmax.f32 %v2519_v45, 0.0  ;;  %v1932_v27 = vmax.f32 %v2551_v24, 0.0  ;;  %v2521_v28 = vadd.f32 %v1630_v23, %v3230_v11  ;;  %v2553_v29 = vadd.f32 %v1856_v25, %v3234_v16 }
 0x22a   : > { %v1933_v31 = vmax.f32 %v2520_v36, 0.0  ;;  %v1935_v32 = vmax.f32 %v2552_v48, 0.0 }
 0x22b   : > { %v2486_v0 = vpack.c.bf16 %v1930_v26, %v1929_v12  ;;  %v2487_v35 = vpack.c.bf16 %v1932_v27, %v1931_v22  ;;  %v1934_v38 = vmax.f32 %v2521_v28, 0.0  ;;  %v1936_v42 = vmax.f32 %v2553_v29, 0.0 }
 0x22d   : > { %2185 = vst [vmem:[%s3248_s16] sm:$0xff] %v2486_v0  ;;  %2186 = vst [vmem:[%s3248_s16 + $0x8] sm:$0xff] %v2487_v35  ;;  %v2488_v44 = vpack.c.bf16 %v1934_v38, %v1933_v31  ;;  %v2489_v46 = vpack.c.bf16 %v1936_v42, %v1935_v32  ;;  %v1634_v47 = vpop.f32.mrb[36].mxu0  ;;  %v1860_v49 = vpop.f32.mrb[36].mxu1 }
 0x22e   : > { %v2522_v40 = vadd.f32 %v1634_v47, %v3222_v30  ;;  %v2554_v50 = vadd.f32 %v1860_v49, %v3226_v34  ;;  %v1636_v51 = vpop.f32.mrb[37].mxu0  ;;  %v1862_v52 = vpop.f32.mrb[37].mxu1 }
 0x22f   : > { %2187 = vst [vmem:[%s3248_s16 + $0x10] sm:$0xff] %v2488_v44  ;;  %2188 = vst [vmem:[%s3248_s16 + $0x18] sm:$0xff] %v2489_v46  ;;  %v2523_v53 = vadd.f32 %v1636_v51, %v3230_v11  ;;  %v2555_v55 = vadd.f32 %v1862_v52, %v3234_v16  ;;  %v1638_v58 = vpop.f32.mrb[38].mxu0  ;;  %v1864_v41 = vpop.f32.mrb[38].mxu1 }
 0x230   : > { %v1937_v59 = vmax.f32 %v2522_v40, 0.0  ;;  %v1939_v60 = vmax.f32 %v2554_v50, 0.0  ;;  %v2524_v61 = vadd.f32 %v1638_v58, %v3222_v30  ;;  %v2556_v63 = vadd.f32 %v1864_v41, %v3226_v34  ;;  %v1640_v1 = vpop.f32.mrb[39].mxu0  ;;  %v1866_v2 = vpop.f32.mrb[39].mxu1 }
 0x231   : > { %v1938_v3 = vmax.f32 %v2523_v53, 0.0  ;;  %v1940_v4 = vmax.f32 %v2555_v55, 0.0  ;;  %v2525_v5 = vadd.f32 %v1640_v1, %v3230_v11  ;;  %v2557_v7 = vadd.f32 %v1866_v2, %v3234_v16 }
 0x232   : > { %v1941_v8 = vmax.f32 %v2524_v61, 0.0  ;;  %v1943_v9 = vmax.f32 %v2556_v63, 0.0 }
 0x233   : > { %v2490_v10 = vpack.c.bf16 %v1938_v3, %v1937_v59  ;;  %v2491_v13 = vpack.c.bf16 %v1940_v4, %v1939_v60  ;;  %v1942_v14 = vmax.f32 %v2525_v5, 0.0  ;;  %v1944_v15 = vmax.f32 %v2557_v7, 0.0 }
 0x235   : > { %2189 = vst [vmem:[%s3248_s16 + $0x20] sm:$0xff] %v2490_v10  ;;  %2190 = vst [vmem:[%s3248_s16 + $0x28] sm:$0xff] %v2491_v13  ;;  %v2492_v17 = vpack.c.bf16 %v1942_v14, %v1941_v8  ;;  %v2493_v18 = vpack.c.bf16 %v1944_v15, %v1943_v9  ;;  %v1644_v20 = vpop.f32.mrb[40].mxu0  ;;  %v1870_v21 = vpop.f32.mrb[40].mxu1 }
 0x236   : > { %v2526_v54 = vadd.f32 %v1644_v20, %v3222_v30  ;;  %v2558_v57 = vadd.f32 %v1870_v21, %v3226_v34  ;;  %v1646_v56 = vpop.f32.mrb[41].mxu0  ;;  %v1872_v62 = vpop.f32.mrb[41].mxu1 }
 0x237   : > { %2191 = vst [vmem:[%s3248_s16 + $0x30] sm:$0xff] %v2492_v17  ;;  %2192 = vst [vmem:[%s3248_s16 + $0x38] sm:$0xff] %v2493_v18  ;;  %v2527_v33 = vadd.f32 %v1646_v56, %v3230_v11  ;;  %v2559_v43 = vadd.f32 %v1872_v62, %v3234_v16  ;;  %v1648_v37 = vpop.f32.mrb[42].mxu0  ;;  %v1874_v19 = vpop.f32.mrb[42].mxu1 }
 0x238   : > { %v1945_v45 = vmax.f32 %v2526_v54, 0.0  ;;  %v1947_v24 = vmax.f32 %v2558_v57, 0.0  ;;  %v2528_v6 = vadd.f32 %v1648_v37, %v3222_v30  ;;  %v2560_v39 = vadd.f32 %v1874_v19, %v3226_v34  ;;  %v1650_v12 = vpop.f32.mrb[43].mxu0  ;;  %v1876_v22 = vpop.f32.mrb[43].mxu1 }
 0x239   : > { %v1946_v36 = vmax.f32 %v2527_v33, 0.0  ;;  %v1948_v48 = vmax.f32 %v2559_v43, 0.0  ;;  %v2529_v23 = vadd.f32 %v1650_v12, %v3230_v11  ;;  %v2561_v25 = vadd.f32 %v1876_v22, %v3234_v16 }
 0x23a   : > { %v1949_v26 = vmax.f32 %v2528_v6, 0.0  ;;  %v1951_v27 = vmax.f32 %v2560_v39, 0.0 }
 0x23b   : > { %v2494_v28 = vpack.c.bf16 %v1946_v36, %v1945_v45  ;;  %v2495_v29 = vpack.c.bf16 %v1948_v48, %v1947_v24  ;;  %v1950_v31 = vmax.f32 %v2529_v23, 0.0  ;;  %v1952_v32 = vmax.f32 %v2561_v25, 0.0 }
 0x23d   : > { %2193 = vst [vmem:[%s3248_s16 + $0x40] sm:$0xff] %v2494_v28  ;;  %2194 = vst [vmem:[%s3248_s16 + $0x48] sm:$0xff] %v2495_v29  ;;  %v2496_v0 = vpack.c.bf16 %v1950_v31, %v1949_v26  ;;  %v2497_v35 = vpack.c.bf16 %v1952_v32, %v1951_v27  ;;  %v1654_v38 = vpop.f32.mrb[44].mxu0  ;;  %v1880_v42 = vpop.f32.mrb[44].mxu1 }
 0x23e   : > { %v2530_v44 = vadd.f32 %v1654_v38, %v3222_v30  ;;  %v2562_v46 = vadd.f32 %v1880_v42, %v3226_v34  ;;  %v1656_v47 = vpop.f32.mrb[45].mxu0  ;;  %v1882_v49 = vpop.f32.mrb[45].mxu1 }
 0x23f   : > { %2195 = vst [vmem:[%s3248_s16 + $0x50] sm:$0xff] %v2496_v0  ;;  %2196 = vst [vmem:[%s3248_s16 + $0x58] sm:$0xff] %v2497_v35  ;;  %v2531_v40 = vadd.f32 %v1656_v47, %v3230_v11  ;;  %v2563_v50 = vadd.f32 %v1882_v49, %v3234_v16  ;;  %v1658_v51 = vpop.f32.mrb[46].mxu0  ;;  %v1884_v52 = vpop.f32.mrb[46].mxu1 }
 0x240   : > { %v1953_v53 = vmax.f32 %v2530_v44, 0.0  ;;  %v1955_v55 = vmax.f32 %v2562_v46, 0.0  ;;  %v2532_v58 = vadd.f32 %v1658_v51, %v3222_v30  ;;  %v2564_v41 = vadd.f32 %v1884_v52, %v3226_v34  ;;  %v1660_v59 = vpop.f32.mrb[47].mxu0  ;;  %v1886_v60 = vpop.f32.mrb[47].mxu1 }
 0x241   : > { %v1954_v61 = vmax.f32 %v2531_v40, 0.0  ;;  %v1956_v63 = vmax.f32 %v2563_v50, 0.0  ;;  %v2533_v1 = vadd.f32 %v1660_v59, %v3230_v11  ;;  %v2565_v2 = vadd.f32 %v1886_v60, %v3234_v16 }
 0x242   : > { %v1957_v3 = vmax.f32 %v2532_v58, 0.0  ;;  %v1959_v4 = vmax.f32 %v2564_v41, 0.0 }
 0x243   : > { %v2498_v5 = vpack.c.bf16 %v1954_v61, %v1953_v53  ;;  %v2499_v7 = vpack.c.bf16 %v1956_v63, %v1955_v55  ;;  %v1958_v8 = vmax.f32 %v2533_v1, 0.0  ;;  %v1960_v9 = vmax.f32 %v2565_v2, 0.0 }
 0x245   : > { %2197 = vst [vmem:[%s3248_s16 + $0x60] sm:$0xff] %v2498_v5  ;;  %2198 = vst [vmem:[%s3248_s16 + $0x68] sm:$0xff] %v2499_v7  ;;  %v2500_v10 = vpack.c.bf16 %v1958_v8, %v1957_v3  ;;  %v2501_v13 = vpack.c.bf16 %v1960_v9, %v1959_v4  ;;  %v1664_v14 = vpop.f32.mrb[48].mxu0  ;;  %v1890_v15 = vpop.f32.mrb[48].mxu1 }
 0x246   : > { %v2534_v17 = vadd.f32 %v1664_v14, %v3222_v30  ;;  %v2566_v18 = vadd.f32 %v1890_v15, %v3226_v34  ;;  %v1666_v20 = vpop.f32.mrb[49].mxu0  ;;  %v1892_v21 = vpop.f32.mrb[49].mxu1 }
 0x247   : > { %2199 = vst [vmem:[%s3248_s16 + $0x70] sm:$0xff] %v2500_v10  ;;  %2200 = vst [vmem:[%s3248_s16 + $0x78] sm:$0xff] %v2501_v13  ;;  %v2535_v54 = vadd.f32 %v1666_v20, %v3230_v11  ;;  %v2567_v57 = vadd.f32 %v1892_v21, %v3234_v16  ;;  %v1668_v56 = vpop.f32.mrb[50].mxu0  ;;  %v1894_v62 = vpop.f32.mrb[50].mxu1 }
 0x248   : > { %v1961_v33 = vmax.f32 %v2534_v17, 0.0  ;;  %v1963_v43 = vmax.f32 %v2566_v18, 0.0  ;;  %v2536_v37 = vadd.f32 %v1668_v56, %v3222_v30  ;;  %v2568_v19 = vadd.f32 %v1894_v62, %v3226_v34  ;;  %v1670_v45 = vpop.f32.mrb[51].mxu0  ;;  %v1896_v24 = vpop.f32.mrb[51].mxu1 }
 0x249   : > { %v1962_v6 = vmax.f32 %v2535_v54, 0.0  ;;  %v1964_v39 = vmax.f32 %v2567_v57, 0.0  ;;  %v2537_v12 = vadd.f32 %v1670_v45, %v3230_v11  ;;  %v2569_v22 = vadd.f32 %v1896_v24, %v3234_v16 }
 0x24a   : > { %v1965_v36 = vmax.f32 %v2536_v37, 0.0  ;;  %v1967_v48 = vmax.f32 %v2568_v19, 0.0 }
 0x24b   : > { %v2502_v23 = vpack.c.bf16 %v1962_v6, %v1961_v33  ;;  %v2503_v25 = vpack.c.bf16 %v1964_v39, %v1963_v43  ;;  %v1966_v26 = vmax.f32 %v2537_v12, 0.0  ;;  %v1968_v27 = vmax.f32 %v2569_v22, 0.0 }
 0x24d   : > { %2201 = vst [vmem:[%s3248_s16 + $0x80] sm:$0xff] %v2502_v23  ;;  %2202 = vst [vmem:[%s3248_s16 + $0x88] sm:$0xff] %v2503_v25  ;;  %v2504_v28 = vpack.c.bf16 %v1966_v26, %v1965_v36  ;;  %v2505_v29 = vpack.c.bf16 %v1968_v27, %v1967_v48  ;;  %v1674_v31 = vpop.f32.mrb[52].mxu0  ;;  %v1900_v32 = vpop.f32.mrb[52].mxu1 }
 0x24e   : > { %v2538_v0 = vadd.f32 %v1674_v31, %v3222_v30  ;;  %v2570_v35 = vadd.f32 %v1900_v32, %v3226_v34  ;;  %v1676_v38 = vpop.f32.mrb[53].mxu0  ;;  %v1902_v42 = vpop.f32.mrb[53].mxu1 }
 0x24f   : > { %2203 = vst [vmem:[%s3248_s16 + $0x90] sm:$0xff] %v2504_v28  ;;  %2204 = vst [vmem:[%s3248_s16 + $0x98] sm:$0xff] %v2505_v29  ;;  %v2539_v44 = vadd.f32 %v1676_v38, %v3230_v11  ;;  %v2571_v46 = vadd.f32 %v1902_v42, %v3234_v16  ;;  %v1678_v47 = vpop.f32.mrb[54].mxu0  ;;  %v1904_v49 = vpop.f32.mrb[54].mxu1 }
 0x250   : > { %v1969_v40 = vmax.f32 %v2538_v0, 0.0  ;;  %v1971_v50 = vmax.f32 %v2570_v35, 0.0  ;;  %v2540_v51 = vadd.f32 %v1678_v47, %v3222_v30  ;;  %v2572_v52 = vadd.f32 %v1904_v49, %v3226_v34  ;;  %v1680_v53 = vpop.f32.mrb[55].mxu0  ;;  %v1906_v55 = vpop.f32.mrb[55].mxu1 }
 0x251   : > { %v1970_v58 = vmax.f32 %v2539_v44, 0.0  ;;  %v1972_v41 = vmax.f32 %v2571_v46, 0.0  ;;  %v2541_v59 = vadd.f32 %v1680_v53, %v3230_v11  ;;  %v2573_v60 = vadd.f32 %v1906_v55, %v3234_v16 }
 0x252   : > { %v1973_v61 = vmax.f32 %v2540_v51, 0.0  ;;  %v1975_v63 = vmax.f32 %v2572_v52, 0.0 }
 0x253   : > { %v2506_v1 = vpack.c.bf16 %v1970_v58, %v1969_v40  ;;  %v2507_v2 = vpack.c.bf16 %v1972_v41, %v1971_v50  ;;  %v1974_v3 = vmax.f32 %v2541_v59, 0.0  ;;  %v1976_v4 = vmax.f32 %v2573_v60, 0.0 }
 0x255   : > { %2205 = vst [vmem:[%s3248_s16 + $0xa0] sm:$0xff] %v2506_v1  ;;  %2206 = vst [vmem:[%s3248_s16 + $0xa8] sm:$0xff] %v2507_v2  ;;  %v2508_v5 = vpack.c.bf16 %v1974_v3, %v1973_v61  ;;  %v2509_v7 = vpack.c.bf16 %v1976_v4, %v1975_v63  ;;  %v1684_v8 = vpop.f32.mrb[56].mxu0  ;;  %v1910_v9 = vpop.f32.mrb[56].mxu1 }
 0x256   : > { %v2542_v10 = vadd.f32 %v1684_v8, %v3222_v30  ;;  %v2574_v13 = vadd.f32 %v1910_v9, %v3226_v34  ;;  %v1686_v14 = vpop.f32.mrb[57].mxu0  ;;  %v1912_v15 = vpop.f32.mrb[57].mxu1 }
 0x257   : > { %2207 = vst [vmem:[%s3248_s16 + $0xb0] sm:$0xff] %v2508_v5  ;;  %2208 = vst [vmem:[%s3248_s16 + $0xb8] sm:$0xff] %v2509_v7  ;;  %v2543_v17 = vadd.f32 %v1686_v14, %v3230_v11  ;;  %v2575_v18 = vadd.f32 %v1912_v15, %v3234_v16  ;;  %v1688_v20 = vpop.f32.mrb[58].mxu0  ;;  %v1914_v21 = vpop.f32.mrb[58].mxu1 }
 0x258   : > { %v1977_v54 = vmax.f32 %v2542_v10, 0.0  ;;  %v1979_v57 = vmax.f32 %v2574_v13, 0.0  ;;  %v2544_v56 = vadd.f32 %v1688_v20, %v3222_v30  ;;  %v2576_v62 = vadd.f32 %v1914_v21, %v3226_v34  ;;  %v1690_v33 = vpop.f32.mrb[59].mxu0  ;;  %v1916_v43 = vpop.f32.mrb[59].mxu1 }
 0x259   : > { %v1978_v37 = vmax.f32 %v2543_v17, 0.0  ;;  %v1980_v19 = vmax.f32 %v2575_v18, 0.0  ;;  %v2545_v45 = vadd.f32 %v1690_v33, %v3230_v11  ;;  %v2577_v24 = vadd.f32 %v1916_v43, %v3234_v16 }
 0x25a   : > { %v1981_v6 = vmax.f32 %v2544_v56, 0.0  ;;  %v1983_v39 = vmax.f32 %v2576_v62, 0.0 }
 0x25b   : > { %v2510_v12 = vpack.c.bf16 %v1978_v37, %v1977_v54  ;;  %v2511_v22 = vpack.c.bf16 %v1980_v19, %v1979_v57  ;;  %v1982_v36 = vmax.f32 %v2545_v45, 0.0  ;;  %v1984_v48 = vmax.f32 %v2577_v24, 0.0 }
 0x25d   : > { %2209 = vst [vmem:[%s3248_s16 + $0xc0] sm:$0xff] %v2510_v12  ;;  %2210 = vst [vmem:[%s3248_s16 + $0xc8] sm:$0xff] %v2511_v22  ;;  %v2512_v23 = vpack.c.bf16 %v1982_v36, %v1981_v6  ;;  %v2513_v25 = vpack.c.bf16 %v1984_v48, %v1983_v39  ;;  %v1694_v26 = vpop.f32.mrb[60].mxu0  ;;  %v1920_v27 = vpop.f32.mrb[60].mxu1 }
 0x25e   : > { %v2546_v28 = vadd.f32 %v1694_v26, %v3222_v30  ;;  %v2578_v29 = vadd.f32 %v1920_v27, %v3226_v34  ;;  %v1696_v31 = vpop.f32.mrb[61].mxu0  ;;  %v1922_v32 = vpop.f32.mrb[61].mxu1 }
 0x25f   : > { %2211 = vst [vmem:[%s3248_s16 + $0xd0] sm:$0xff] %v2512_v23  ;;  %2212 = vst [vmem:[%s3248_s16 + $0xd8] sm:$0xff] %v2513_v25  ;;  %v2547_v0 = vadd.f32 %v1696_v31, %v3230_v11  ;;  %v2579_v35 = vadd.f32 %v1922_v32, %v3234_v16  ;;  %v1698_v38 = vpop.f32.mrb[62].mxu0  ;;  %v1924_v42 = vpop.f32.mrb[62].mxu1 }
 0x260   : > { %v1985_v44 = vmax.f32 %v2546_v28, 0.0  ;;  %v1987_v46 = vmax.f32 %v2578_v29, 0.0  ;;  %v2548_v47 = vadd.f32 %v1698_v38, %v3222_v30  ;;  %v2580_v49 = vadd.f32 %v1924_v42, %v3226_v34  ;;  %v1700_v40 = vpop.f32.mrb[63].mxu0  ;;  %v1926_v50 = vpop.f32.mrb[63].mxu1 }
 0x261   : > { %v1986_v51 = vmax.f32 %v2547_v0, 0.0  ;;  %v1988_v52 = vmax.f32 %v2579_v35, 0.0  ;;  %v2549_v53 = vadd.f32 %v1700_v40, %v3230_v11  ;;  %v2581_v55 = vadd.f32 %v1926_v50, %v3234_v16 }
 0x262   : > { %v1989_v58 = vmax.f32 %v2548_v47, 0.0  ;;  %v1991_v41 = vmax.f32 %v2580_v49, 0.0 }
 0x263   : > { %v2514_v59 = vpack.c.bf16 %v1986_v51, %v1985_v44  ;;  %v2515_v60 = vpack.c.bf16 %v1988_v52, %v1987_v46  ;;  %v1990_v61 = vmax.f32 %v2549_v53, 0.0  ;;  %v1992_v63 = vmax.f32 %v2581_v55, 0.0 }
 0x265   : > { %2213 = vst [vmem:[%s3248_s16 + $0xe0] sm:$0xff] %v2514_v59  ;;  %2214 = vst [vmem:[%s3248_s16 + $0xe8] sm:$0xff] %v2515_v60  ;;  %v2516_v30 = vpack.c.bf16 %v1990_v61, %v1989_v58  ;;  %v2517_v34 = vpack.c.bf16 %v1992_v63, %v1991_v41 }
 0x267   : > { %2215 = vst [vmem:[%s3248_s16 + $0xf0] sm:$0xff] %v2516_v30  ;;  %2216 = vst [vmem:[%s3248_s16 + $0xf8] sm:$0xff] %v2517_v34 }
 0x268 PF: > { %s16_s18 = sadd.s32 1, %s2910_s18  }
 0x269   : > { %p13_p3 = scmp.ge.s32.totalorder %s16_s18, 4  }
 0x26b   :  { %15 = sbr.rel (!%p13_p3) target bundleno = 1 (0x1), region = 75 }
 0x272   :  { %2241 = vsyncpa [#allocation3], 1 }
 0x273   :  { %2243 = vsyncpa [#allocation3 + $0x1], 1 }

</bundles_post_ra>
